<compile_context>
chip_gen: v7x
topology: tpu7x:2x2x1
jax: 0.10.0
libtpu: 0.0.40
codegen_flags: <defaults>
</compile_context>

<pallas_src>
import functools

import jax
import jax.numpy as jnp
from jax import lax
from jax.experimental import pallas as pl
from jax.experimental.pallas import tpu as pltpu

_VMEM_LIMIT = 48 * 1024 * 1024  # fits v7x's 64 MiB physical VMEM; raise on v5e/v6e


def _row_tile(h, cap):
    t = min(h, cap)
    while h % t:
        t -= 1
    return t


def _compiler_params(dims):
    return pltpu.CompilerParams(dimension_semantics=dims,
                                vmem_limit_bytes=_VMEM_LIMIT)


# ---------------------------------------------------------------------------
# In-kernel zero padding: build a (th+2, W+2, Cin) halo tile in VMEM scratch
# from the unpadded resident plane.  `xform` is applied to real data only
# (fused GroupNorm affine + Swish); the border stays exactly zero, matching the
# reference which pads AFTER GroupNorm/Swish.
# ---------------------------------------------------------------------------
def _fill_padded_tile(pad_scr, x_ref, row0, th, r, nrows, xform):
    w_in = x_ref.shape[2]
    c_in = x_ref.shape[3]
    pad_scr[pl.ds(1, th), pl.ds(1, w_in), :] = xform(x_ref[0, pl.ds(row0, th), :, :])
    zcol = jnp.zeros((th + 2, 1, c_in), pad_scr.dtype)
    pad_scr[:, pl.ds(0, 1), :] = zcol
    pad_scr[:, pl.ds(w_in + 1, 1), :] = zcol
    zrow = jnp.zeros((1, w_in, c_in), pad_scr.dtype)

    @pl.when(r > 0)
    def _():
        pad_scr[pl.ds(0, 1), pl.ds(1, w_in), :] = xform(
            x_ref[0, pl.ds(row0 - 1, 1), :, :])

    @pl.when(r == 0)
    def _():
        pad_scr[pl.ds(0, 1), pl.ds(1, w_in), :] = zrow

    @pl.when(r < nrows - 1)
    def _():
        pad_scr[pl.ds(th + 1, 1), pl.ds(1, w_in), :] = xform(
            x_ref[0, pl.ds(row0 + th, 1), :, :])

    @pl.when(r == nrows - 1)
    def _():
        pad_scr[pl.ds(th + 1, 1), pl.ds(1, w_in), :] = zrow


# ---------------------------------------------------------------------------
# 3x3 convolution (row-tiled) with fused pad, optional fused GroupNorm-affine +
# Swish on the input and optional fused residual add / 1x1 skip projection.
# ---------------------------------------------------------------------------
def _conv3x3_kernel(*refs, norm, swish, skip_kind):
    idx = 0
    x_ref = refs[idx]; idx += 1        # (1, H, W, Cin) bf16, resident per batch item
    w_ref = refs[idx]; idx += 1        # (3, 3*Cin, Cout) bf16, dx-major K blocks
    b_ref = refs[idx]; idx += 1        # (1, Cout) f32
    scale_ref = shift_ref = None
    if norm:
        scale_ref = refs[idx]; shift_ref = refs[idx + 1]; idx += 2   # (1,1,Cin) f32
    res_ref = skipx_ref = skipw_ref = None
    if skip_kind == "add":
        res_ref = refs[idx]; idx += 1                                # (1,th,W,Cout)
    elif skip_kind == "conv":
        skipx_ref = refs[idx]; skipw_ref = refs[idx + 1]; idx += 2   # x tile, (Cs,Cout)
    o_ref = refs[idx]                   # (1, th, W, Cout) bf16
    pad_scr = refs[idx + 1]             # (th+2, W+2, Cin) bf16 scratch

    _, th, w_out, c_out = o_ref.shape
    c_in = x_ref.shape[-1]
    r = pl.program_id(1)
    nrows = pl.num_programs(1)
    row0 = pl.multiple_of(r * th, th)

    def xform(v):  # fused GroupNorm affine + Swish, applied while filling scratch
        if not norm:
            return v
        vf = v.astype(jnp.float32) * scale_ref[0] + shift_ref[0]
        if swish:
            vf = vf * jax.nn.sigmoid(vf)
        return vf.astype(v.dtype)

    _fill_padded_tile(pad_scr, x_ref, row0, th, r, nrows, xform)

    # TODO(synk): try pltpu.roll on the W axis instead of the dx-offset slices
    # (XLU has slack here) once verified on all generations.
    acc = jnp.zeros((th * w_out, c_out), jnp.float32)
    for dy in range(3):
        parts = [pad_scr[pl.ds(dy, th), pl.ds(dx, w_out), :] for dx in range(3)]
        cat = jnp.concatenate(parts, axis=-1).reshape(th * w_out, 3 * c_in)
        acc = acc + jnp.dot(cat, w_ref[dy], preferred_element_type=jnp.float32)
    acc = acc + b_ref[...]
    if skip_kind == "add":
        acc = acc + res_ref[0].astype(jnp.float32).reshape(th * w_out, c_out)
    elif skip_kind == "conv":
        sx = skipx_ref[0].reshape(th * w_out, skipx_ref.shape[-1])
        acc = acc + jnp.dot(sx, skipw_ref[...], preferred_element_type=jnp.float32)
    o_ref[0] = acc.reshape(th, w_out, c_out).astype(o_ref.dtype)


def conv3x3(x, w, b, *, scale=None, shift=None, swish=False,
            residual=None, skip=None, row_cap=32):
    """x: (N,H,W,Cin); w: (3,3,Cin,Cout); b: (Cout,).  Returns bf16 NHWC.

    scale/shift: per-(batch,channel) GroupNorm affine applied to the input
                 (plus Swish if swish=True) before the conv; pad stays zero.
    residual   : tensor of the output shape added to the result.
    skip       : (x_skip, w_skip, b_skip) fused 1x1 skip projection added in.
    """
    n, h, w_sp, c_in = x.shape
    c_out = w.shape[-1]
    th = _row_tile(h, row_cap)   # v5e/v6e can afford row_cap=64; keep 32 on v7x.

    b_total = b if skip is None else b + skip[2]
    norm = scale is not None
    skip_kind = "add" if residual is not None else ("conv" if skip is not None else None)

    in_specs = [
        pl.BlockSpec((1, h, w_sp, c_in), lambda i, r: (i, 0, 0, 0)),
        pl.BlockSpec((3, 3 * c_in, c_out), lambda i, r: (0, 0, 0)),
        pl.BlockSpec((1, c_out), lambda i, r: (0, 0)),
    ]
    args = [x.astype(jnp.bfloat16),
            w.reshape(3, 3 * c_in, c_out).astype(jnp.bfloat16),
            b_total.reshape(1, c_out).astype(jnp.float32)]
    if norm:
        stat_spec = pl.BlockSpec((1, 1, c_in), lambda i, r: (i, 0, 0))
        in_specs += [stat_spec, stat_spec]
        args += [scale, shift]
    if skip_kind == "add":
        in_specs.append(pl.BlockSpec((1, th, w_sp, c_out), lambda i, r: (i, r, 0, 0)))
        args.append(residual.astype(jnp.bfloat16))
    elif skip_kind == "conv":
        x_skip, w_skip, _ = skip
        c_skip = w_skip.shape[0]
        in_specs.append(pl.BlockSpec((1, th, w_sp, c_skip), lambda i, r: (i, r, 0, 0)))
        in_specs.append(pl.BlockSpec((c_skip, c_out), lambda i, r: (0, 0)))
        args.append(x_skip.astype(jnp.bfloat16))
        args.append(w_skip.astype(jnp.bfloat16))

    return pl.pallas_call(
        functools.partial(_conv3x3_kernel, norm=norm, swish=swish,
                          skip_kind=skip_kind),
        out_shape=jax.ShapeDtypeStruct((n, h, w_sp, c_out), jnp.bfloat16),
        grid=(n, h // th),
        in_specs=in_specs,
        out_specs=pl.BlockSpec((1, th, w_sp, c_out), lambda i, r: (i, r, 0, 0)),
        scratch_shapes=[pltpu.VMEM((th + 2, w_sp + 2, c_in), jnp.bfloat16)],
        compiler_params=_compiler_params(("parallel", "parallel")),
    )(*args)


# ---------------------------------------------------------------------------
# Fused nearest-2x upsample + 3x3 convolution (pad fused, bf16 patch build)
# ---------------------------------------------------------------------------
def _upsample_conv3x3_kernel(x_ref, w_ref, b_ref, o_ref, pad_scr):
    """x_ref: (1, Hs, Ws, Cin) low-res plane; column replication folded into
    w_ref (output lanes = [even output column | odd output column]); row
    replication done in VMEM with leading-dim ops only."""
    _, tho, ws, c2 = o_ref.shape
    ths = tho // 2
    c_in = x_ref.shape[-1]
    r = pl.program_id(1)
    nrows = pl.num_programs(1)
    row0 = pl.multiple_of(r * ths, ths)

    _fill_padded_tile(pad_scr, x_ref, row0, ths, r, nrows, lambda v: v)

    def up_rows(dx):  # (ths+2, ws, Cin) -> (tho+2, ws, Cin), nearest rows, bf16
        v = pad_scr[:, pl.ds(dx, ws), :]
        mid = jnp.repeat(v[1:ths + 1], 2, axis=0)
        return jnp.concatenate([v[0:1], mid, v[ths + 1:ths + 2]], axis=0)

    cols = [up_rows(dx) for dx in range(3)]
    acc = jnp.zeros((tho * ws, c2), jnp.float32)
    for dy in range(3):
        cat = jnp.concatenate([col[dy:dy + tho] for col in cols], axis=-1)
        cat = cat.reshape(tho * ws, 3 * c_in)
        acc = acc + jnp.dot(cat, w_ref[dy], preferred_element_type=jnp.float32)
    acc = acc + b_ref[...]
    o_ref[0] = acc.reshape(tho, ws, c2).astype(o_ref.dtype)


def _upsample_conv_weights(w):
    """Fold nearest-2x column replication into the taps: (3,3,Cin,Cout) ->
    (3, 3*Cin, 2*Cout); per dy, K blocks are source columns (j-1, j, j+1);
    output lanes are [even output column | odd output column]."""
    a0, a1 = w[:, 0], w[:, 1] + w[:, 2]          # even-column phase
    b0, b1 = w[:, 0] + w[:, 1], w[:, 2]          # odd-column phase
    zero = jnp.zeros_like(a0)
    k0 = jnp.concatenate([a0, zero], axis=-1)
    k1 = jnp.concatenate([a1, b0], axis=-1)
    k2 = jnp.concatenate([zero, b1], axis=-1)
    return jnp.concatenate([k0, k1, k2], axis=1)


def upsample_conv3x3(x, w, b, row_cap=16):
    """fun.interpolate(scale=2, nearest) + Conv3x3, fused (no 4x HBM staging)."""
    n, hs, ws, c_in = x.shape
    c_out = w.shape[-1]
    ths = _row_tile(hs, row_cap)
    wk = _upsample_conv_weights(w).astype(jnp.bfloat16)
    bk = jnp.concatenate([b, b]).reshape(1, 2 * c_out).astype(jnp.float32)
    ho = 2 * hs
    y = pl.pallas_call(
        _upsample_conv3x3_kernel,
        out_shape=jax.ShapeDtypeStruct((n, ho, ws, 2 * c_out), jnp.bfloat16),
        grid=(n, hs // ths),
        in_specs=[
            pl.BlockSpec((1, hs, ws, c_in), lambda i, r: (i, 0, 0, 0)),
            pl.BlockSpec((3, 3 * c_in, 2 * c_out), lambda i, r: (0, 0, 0)),
            pl.BlockSpec((1, 2 * c_out), lambda i, r: (0, 0)),
        ],
        out_specs=pl.BlockSpec((1, 2 * ths, ws, 2 * c_out), lambda i, r: (i, r, 0, 0)),
        scratch_shapes=[pltpu.VMEM((ths + 2, ws + 2, c_in), jnp.bfloat16)],
        compiler_params=_compiler_params(("parallel", "parallel")),
    )(x.astype(jnp.bfloat16), wk, bk)
    # (N, Ho, Ws, 2, Cout) -> (N, Ho, 2*Ws, Cout): pure row-major metadata reshape.
    return y.reshape(n, ho, ws, 2, c_out).reshape(n, ho, 2 * ws, c_out)


# ---------------------------------------------------------------------------
# GroupNorm(32, C) statistics only: emits per-(N, channel) scale/shift so the
# normalize (+Swish) can be fused into the consumer kernel.
# ---------------------------------------------------------------------------
def _gn_stats_kernel(x_ref, g_ref, b_ref, gm_ref, gmt_ref, scale_ref, shift_ref,
                     *, inv_count, eps, n_chunks):
    hw = x_ref.shape[1]
    c = x_ref.shape[2]
    chunk = hw // n_chunks

    def sum_body(i, acc):
        xc = x_ref[0, pl.ds(i * chunk, chunk), :].astype(jnp.float32)
        return acc + jnp.sum(xc, axis=0, keepdims=True)

    s = lax.fori_loop(0, n_chunks, sum_body, jnp.zeros((1, c), jnp.float32))
    mean_g = jnp.dot(s, gm_ref[...], preferred_element_type=jnp.float32) * inv_count
    mean_c = jnp.dot(mean_g, gmt_ref[...], preferred_element_type=jnp.float32)

    def var_body(i, acc):
        xc = x_ref[0, pl.ds(i * chunk, chunk), :].astype(jnp.float32)
        d = xc - mean_c
        return acc + jnp.sum(d * d, axis=0, keepdims=True)

    ss = lax.fori_loop(0, n_chunks, var_body, jnp.zeros((1, c), jnp.float32))
    var_g = jnp.dot(ss, gm_ref[...], preferred_element_type=jnp.float32) * inv_count
    rstd_c = jnp.dot(lax.rsqrt(var_g + eps), gmt_ref[...],
                     preferred_element_type=jnp.float32)
    scale = rstd_c * g_ref[0]
    shift = b_ref[0] - mean_c * scale
    scale_ref[0] = scale
    shift_ref[0] = shift


def gn_stats(x, gamma, beta, *, eps=1e-5, num_groups=32):
    """Returns per-(batch, channel) (scale, shift) f32 arrays of shape (N,1,C)."""
    n, h, w_sp, c = x.shape
    hw = h * w_sp
    cg = c // num_groups
    gm = (jnp.arange(c)[:, None] // cg
          == jnp.arange(num_groups)[None, :]).astype(jnp.float32)
    chunk_cap = max(8, (2 * 1024 * 1024) // (4 * c))   # bound live f32 to ~2 MB
    chunk = _row_tile(hw, chunk_cap)
    kernel = functools.partial(_gn_stats_kernel, inv_count=1.0 / float(hw * cg),
                               eps=eps, n_chunks=hw // chunk)
    stat_spec = pl.BlockSpec((1, 1, c), lambda i: (i, 0, 0))
    scale, shift = pl.pallas_call(
        kernel,
        out_shape=(jax.ShapeDtypeStruct((n, 1, c), jnp.float32),
                   jax.ShapeDtypeStruct((n, 1, c), jnp.float32)),
        grid=(n,),
        in_specs=[
            pl.BlockSpec((1, hw, c), lambda i: (i, 0, 0)),
            pl.BlockSpec((1, 1, c), lambda i: (0, 0, 0)),
            pl.BlockSpec((1, 1, c), lambda i: (0, 0, 0)),
            pl.BlockSpec((c, num_groups), lambda i: (0, 0)),
            pl.BlockSpec((num_groups, c), lambda i: (0, 0)),
        ],
        out_specs=(stat_spec, stat_spec),
        compiler_params=_compiler_params(("parallel",)),
    )(x.reshape(n, hw, c).astype(jnp.bfloat16),
      gamma.reshape(1, 1, c).astype(jnp.float32),
      beta.reshape(1, 1, c).astype(jnp.float32), gm, gm.T)
    return scale, shift


# ---------------------------------------------------------------------------
# NonLocalBlock: GN-affine -> QKV (1x1) -> CxC attention -> +residual, fused
# (the reference forward never applies self.projection, so neither do we).
# ---------------------------------------------------------------------------
def _nonlocal_attn_kernel(x_ref, scale_ref, shift_ref, wq_ref, wk_ref, wv_ref,
                          bq_ref, bk_ref, bv_ref, o_ref):
    x = x_ref[0]                                                     # (HW, C) bf16
    h = (x.astype(jnp.float32) * scale_ref[0] + shift_ref[0]).astype(jnp.bfloat16)
    q = (jnp.dot(h, wq_ref[...], preferred_element_type=jnp.float32)
         + bq_ref[...]).astype(jnp.bfloat16)
    k = (jnp.dot(h, wk_ref[...], preferred_element_type=jnp.float32)
         + bk_ref[...]).astype(jnp.bfloat16)
    v = (jnp.dot(h, wv_ref[...], preferred_element_type=jnp.float32)
         + bv_ref[...]).astype(jnp.bfloat16)
    # s[i, j] = sum_p q[p, i] * k[p, j]   (reference: bmm(q, k^T) on (C, HW) tensors)
    s = lax.dot_general(q, k, (((0,), (0,)), ((), ())),
                        preferred_element_type=jnp.float32)          # (C, C)
    s = s - jnp.max(s, axis=-1, keepdims=True)
    p = jnp.exp(s)
    p = p * pl.reciprocal(jnp.sum(p, axis=-1, keepdims=True), approx=True)
    # out[p, j] = sum_i attn[i, j] * v[p, i]   (reference: bmm(attn^T, v))
    attn_out = jnp.dot(v, p.astype(jnp.bfloat16),
                       preferred_element_type=jnp.float32)           # (HW, C)
    o_ref[0] = (attn_out + x.astype(jnp.float32)).astype(o_ref.dtype)


def nonlocal_attention(x, scale, shift, p):
    n, hh, ww, c = x.shape
    hw = hh * ww
    s_fold = float(c) ** -0.5
    act_spec = pl.BlockSpec((1, hw, c), lambda i: (i, 0, 0))
    stat_spec = pl.BlockSpec((1, 1, c), lambda i: (i, 0, 0))
    w_spec = pl.BlockSpec((c, c), lambda i: (0, 0))
    b_spec = pl.BlockSpec((1, c), lambda i: (0, 0))
    y = pl.pallas_call(
        _nonlocal_attn_kernel,
        out_shape=jax.ShapeDtypeStruct((n, hw, c), jnp.bfloat16),
        grid=(n,),
        in_specs=[act_spec, stat_spec, stat_spec, w_spec, w_spec, w_spec,
                  b_spec, b_spec, b_spec],
        out_specs=act_spec,
        compiler_params=_compiler_params(("parallel",)),
    )(x.reshape(n, hw, c).astype(jnp.bfloat16), scale, shift,
      (p["wq"] * s_fold).astype(jnp.bfloat16), p["wk"].astype(jnp.bfloat16),
      p["wv"].astype(jnp.bfloat16),
      (p["bq"] * s_fold).reshape(1, c).astype(jnp.float32),
      p["bk"].reshape(1, c).astype(jnp.float32),
      p["bv"].reshape(1, c).astype(jnp.float32))
    return y.reshape(n, hh, ww, c)


# ---------------------------------------------------------------------------
# Module forwards (functional, channels-last)
# ---------------------------------------------------------------------------
def residual_block(x, p):
    s1, t1 = gn_stats(x, p["gn1"]["g"], p["gn1"]["b"])
    h = conv3x3(x, p["conv1"]["w"], p["conv1"]["b"], scale=s1, shift=t1, swish=True)
    s2, t2 = gn_stats(h, p["gn2"]["g"], p["gn2"]["b"])
    if p["in_c"] != p["out_c"]:
        return conv3x3(h, p["conv2"]["w"], p["conv2"]["b"], scale=s2, shift=t2,
                       swish=True, skip=(x, p["skip"]["w"], p["skip"]["b"]))
    return conv3x3(h, p["conv2"]["w"], p["conv2"]["b"], scale=s2, shift=t2,
                   swish=True, residual=x)


def nonlocal_block(x, p):
    s, t = gn_stats(x, p["gn"]["g"], p["gn"]["b"])
    return nonlocal_attention(x, s, t, p)


def final_block(x, p, lane_pad=8):
    s, t = gn_stats(x, p["gn"]["g"], p["gn"]["b"])
    c_out = p["w"].shape[-1]
    wp = jnp.pad(p["w"], ((0, 0), (0, 0), (0, 0), (0, lane_pad - c_out)))
    bp = jnp.pad(p["b"], (0, lane_pad - c_out))
    y = conv3x3(x, wp, bp, scale=s, shift=t, swish=True)
    return y[..., :c_out]


# ---------------------------------------------------------------------------
# Deterministic parameter init + decoder builder (mirrors Decoder.build_decoder)
# ---------------------------------------------------------------------------
class _KeyGen:
    def __init__(self, seed=0):
        self._key = jax.random.PRNGKey(seed)
        self._i = 0

    def __call__(self):
        self._i += 1
        return jax.random.fold_in(self._key, self._i)


def _init_conv3x3(kg, cin, cout):
    return {"w": 0.05 * jax.random.normal(kg(), (3, 3, cin, cout), jnp.float32),
            "b": 0.01 * jax.random.normal(kg(), (cout,), jnp.float32)}


def _init_conv1x1(kg, cin, cout):
    return {"w": 0.05 * jax.random.normal(kg(), (cin, cout), jnp.float32),
            "b": 0.01 * jax.random.normal(kg(), (cout,), jnp.float32)}


def _init_gn(kg, c):
    return {"g": 1.0 + 0.05 * jax.random.normal(kg(), (c,), jnp.float32),
            "b": 0.05 * jax.random.normal(kg(), (c,), jnp.float32)}


def _init_resblock(kg, in_c, out_c):
    return {"in_c": in_c, "out_c": out_c,
            "gn1": _init_gn(kg, in_c), "conv1": _init_conv3x3(kg, in_c, out_c),
            "gn2": _init_gn(kg, out_c), "conv2": _init_conv3x3(kg, out_c, out_c),
            "skip": _init_conv1x1(kg, in_c, out_c)}


def _init_nonlocal(kg, c):
    w = 0.05 * jax.random.normal(kg(), (c, 3 * c), jnp.float32)
    bias = 0.01 * jax.random.normal(kg(), (3 * c,), jnp.float32)
    # Reference qkv.reshape(b, c, 3, h*w) reads q/k/v from interleaved output
    # channels {3j, 3j+1, 3j+2}; de-interleave once here so kernels see contiguous
    # blocks (no runtime stride-3 gather).  self.projection is unused in forward.
    return {"gn": _init_gn(kg, c),
            "wq": w[:, 0::3], "wk": w[:, 1::3], "wv": w[:, 2::3],
            "bq": bias[0::3], "bk": bias[1::3], "bv": bias[2::3]}


def init_decoder(kg, num_res_blks=3, channels=(512, 256, 256, 128),
                 resolution=16, attn_res=(16,)):
    """Mirrors Decoder.build_decoder() layer-by-layer."""
    layers = []
    c0 = channels[0]
    layers.append(("conv3", _init_conv3x3(kg, 256, c0)))
    layers.append(("res", _init_resblock(kg, c0, c0)))
    layers.append(("attn", _init_nonlocal(kg, c0)))
    layers.append(("res", _init_resblock(kg, c0, c0)))
    in_c = c0
    for i in range(len(channels)):
        out_c = channels[i]
        for _ in range(num_res_blks):
            layers.append(("res", _init_resblock(kg, in_c, out_c)))
            in_c = out_c
            if resolution in attn_res:
                layers.append(("attn", _init_nonlocal(kg, in_c)))
        if i != 0:
            layers.append(("up", _init_conv3x3(kg, in_c, in_c)))
            resolution *= 2
    final = _init_conv3x3(kg, in_c, 3)
    layers.append(("final", {"gn": _init_gn(kg, in_c),
                             "w": final["w"], "b": final["b"]}))
    return layers


def decoder_forward(x_nchw, layers):
    # layout: NCHW (PyTorch) in -> bf16 NHWC inside kernels -> f32 NCHW out.
    x = jnp.transpose(x_nchw, (0, 2, 3, 1)).astype(jnp.bfloat16)
    for kind, p in layers:
        if kind == "conv3":
            x = conv3x3(x, p["w"], p["b"])
        elif kind == "res":
            x = residual_block(x, p)
        elif kind == "attn":
            x = nonlocal_block(x, p)
        elif kind == "up":
            x = upsample_conv3x3(x, p["w"], p["b"])
        elif kind == "final":
            x = final_block(x, p)
        else:
            raise ValueError(kind)
    return jnp.transpose(x, (0, 3, 1, 2)).astype(jnp.float32)


if __name__ == "__main__":
    kg = _KeyGen(0)
    # Reduced-but-faithful decoder config (same build rules as the reference; the
    # default (3, [512,256,256,128]) also works, just larger).  The first conv's
    # 256 input channels are hardcoded in the reference.
    layers = init_decoder(kg, num_res_blks=1, channels=(64, 32))
    x = jax.random.normal(jax.random.PRNGKey(0), (2, 256, 8, 8), jnp.float32)
    out = decoder_forward(x, layers)
    out = jax.block_until_ready(out)
    assert out.shape == (2, 3, 16, 16), out.shape
    assert bool(jnp.all(jnp.isfinite(out)))
    print("KERNEL_OK")
</pallas_src>

<mosaic_0001>
module attributes {stable_mosaic.version = 11 : i64} {
  func.func @_conv3x3_kernel(%arg0: i32, %arg1: i32, %arg2: memref<1x8x8x256xbf16, #tpu.memory_space<vmem>>, %arg3: memref<3x768x64xbf16, #tpu.memory_space<vmem>>, %arg4: memref<1x64xf32, #tpu.memory_space<vmem>>, %arg5: memref<1x8x8x64xbf16, #tpu.memory_space<vmem>>, %arg6: memref<10x10x256xbf16, #tpu.memory_space<vmem>>) attributes {dimension_semantics = [#tpu.dimension_semantics<parallel>, #tpu.dimension_semantics<parallel>], iteration_bounds = array<i64: 2, 1>, scalar_prefetch = 0 : i64, scratch_operands = 1 : i64, tpu.core_type = #tpu.core_type<tc>, window_params = [{transform_indices = @transform_0, window_bounds = array<i64: 1, 8, 8, 256>}, {pipeline_mode = #tpu.pipeline_mode<synchronous>, transform_indices = @transform_1, window_bounds = array<i64: 3, 768, 64>}, {pipeline_mode = #tpu.pipeline_mode<synchronous>, transform_indices = @transform_2, window_bounds = array<i64: 1, 64>}, {transform_indices = @transform_3, window_bounds = array<i64: 1, 8, 8, 64>}]} {
    %c8_i32 = arith.constant 8 : i32
    %0 = arith.muli %arg1, %c8_i32 : i32
    %1 = tpu.assume_multiple %0, 8 : i32
    %c0 = arith.constant 0 : index
    %2 = arith.index_cast %1 : i32 to index
    %c0_0 = arith.constant 0 : index
    %c0_1 = arith.constant 0 : index
    %3 = vector.load %arg2[%c0, %2, %c0_0, %c0_1] : memref<1x8x8x256xbf16, #tpu.memory_space<vmem>>, vector<1x8x8x256xbf16>
    %4 = vector.shape_cast %3 : vector<1x8x8x256xbf16> to vector<8x8x256xbf16>
    %c1 = arith.constant 1 : index
    %c1_2 = arith.constant 1 : index
    %c0_3 = arith.constant 0 : index
    %5 = vector.load %arg6[%c1, %c1_2, %c0_3] : memref<10x10x256xbf16, #tpu.memory_space<vmem>>, vector<8x8x256xbf16>
    tpu.vector_store %arg6[%c1, %c1_2, %c0_3], %4 {strides = array<i32>} : memref<10x10x256xbf16, #tpu.memory_space<vmem>>, vector<8x8x256xbf16>,
    %cst = arith.constant 0.000000e+00 : bf16
    %6 = vector.broadcast %cst : bf16 to vector<10x1x256xbf16>
    %c0_4 = arith.constant 0 : index
    %c0_5 = arith.constant 0 : index
    %c0_6 = arith.constant 0 : index
    %7 = vector.load %arg6[%c0_4, %c0_5, %c0_6] : memref<10x10x256xbf16, #tpu.memory_space<vmem>>, vector<10x1x256xbf16>
    tpu.vector_store %arg6[%c0_4, %c0_5, %c0_6], %6 {strides = array<i32>} : memref<10x10x256xbf16, #tpu.memory_space<vmem>>, vector<10x1x256xbf16>,
    %c0_7 = arith.constant 0 : index
    %c9 = arith.constant 9 : index
    %c0_8 = arith.constant 0 : index
    %8 = vector.load %arg6[%c0_7, %c9, %c0_8] : memref<10x10x256xbf16, #tpu.memory_space<vmem>>, vector<10x1x256xbf16>
    tpu.vector_store %arg6[%c0_7, %c9, %c0_8], %6 {strides = array<i32>} : memref<10x10x256xbf16, #tpu.memory_space<vmem>>, vector<10x1x256xbf16>,
    %cst_9 = arith.constant 0.000000e+00 : bf16
    %9 = vector.broadcast %cst_9 : bf16 to vector<1x8x256xbf16>
    %c0_i32 = arith.constant 0 : i32
    %10 = arith.cmpi sgt, %arg1, %c0_i32 : i32
    %11 = arith.extui %10 : i1 to i32
    %c0_i32_10 = arith.constant 0 : i32
    %12 = arith.cmpi ne, %11, %c0_i32_10 : i32
    scf.if %12 {
      %c1_i32 = arith.constant 1 : i32
      %58 = arith.subi %1, %c1_i32 : i32
      %c0_62 = arith.constant 0 : index
      %59 = arith.index_cast %58 : i32 to index
      %c0_63 = arith.constant 0 : index
      %c0_64 = arith.constant 0 : index
      %60 = vector.load %arg2[%c0_62, %59, %c0_63, %c0_64] : memref<1x8x8x256xbf16, #tpu.memory_space<vmem>>, vector<1x1x8x256xbf16>
      %61 = vector.shape_cast %60 : vector<1x1x8x256xbf16> to vector<1x8x256xbf16>
      %c0_65 = arith.constant 0 : index
      %c1_66 = arith.constant 1 : index
      %c0_67 = arith.constant 0 : index
      %62 = vector.load %arg6[%c0_65, %c1_66, %c0_67] : memref<10x10x256xbf16, #tpu.memory_space<vmem>>, vector<1x8x256xbf16>
      tpu.vector_store %arg6[%c0_65, %c1_66, %c0_67], %61 {strides = array<i32>} : memref<10x10x256xbf16, #tpu.memory_space<vmem>>, vector<1x8x256xbf16>,
    } else {
    }
    %c0_i32_11 = arith.constant 0 : i32
    %13 = arith.cmpi eq, %arg1, %c0_i32_11 : i32
    %14 = arith.extui %13 : i1 to i32
    %c0_i32_12 = arith.constant 0 : i32
    %15 = arith.cmpi ne, %14, %c0_i32_12 : i32
    scf.if %15 {
      %c0_62 = arith.constant 0 : index
      %c1_63 = arith.constant 1 : index
      %c0_64 = arith.constant 0 : index
      %58 = vector.load %arg6[%c0_62, %c1_63, %c0_64] : memref<10x10x256xbf16, #tpu.memory_space<vmem>>, vector<1x8x256xbf16>
      tpu.vector_store %arg6[%c0_62, %c1_63, %c0_64], %9 {strides = array<i32>} : memref<10x10x256xbf16, #tpu.memory_space<vmem>>, vector<1x8x256xbf16>,
    } else {
    }
    %c0_i32_13 = arith.constant 0 : i32
    %16 = arith.cmpi slt, %arg1, %c0_i32_13 : i32
    %17 = arith.extui %16 : i1 to i32
    %c0_i32_14 = arith.constant 0 : i32
    %18 = arith.cmpi ne, %17, %c0_i32_14 : i32
    scf.if %18 {
      %c8_i32_62 = arith.constant 8 : i32
      %58 = arith.addi %1, %c8_i32_62 : i32
      %c0_63 = arith.constant 0 : index
      %59 = arith.index_cast %58 : i32 to index
      %c0_64 = arith.constant 0 : index
      %c0_65 = arith.constant 0 : index
      %60 = vector.load %arg2[%c0_63, %59, %c0_64, %c0_65] : memref<1x8x8x256xbf16, #tpu.memory_space<vmem>>, vector<1x1x8x256xbf16>
      %61 = vector.shape_cast %60 : vector<1x1x8x256xbf16> to vector<1x8x256xbf16>
      %c9_66 = arith.constant 9 : index
      %c1_67 = arith.constant 1 : index
      %c0_68 = arith.constant 0 : index
      %62 = vector.load %arg6[%c9_66, %c1_67, %c0_68] : memref<10x10x256xbf16, #tpu.memory_space<vmem>>, vector<1x8x256xbf16>
      tpu.vector_store %arg6[%c9_66, %c1_67, %c0_68], %61 {strides = array<i32>} : memref<10x10x256xbf16, #tpu.memory_space<vmem>>, vector<1x8x256xbf16>,
    } else {
    }
    %c0_i32_15 = arith.constant 0 : i32
    %19 = arith.cmpi eq, %arg1, %c0_i32_15 : i32
    %20 = arith.extui %19 : i1 to i32
    %c0_i32_16 = arith.constant 0 : i32
    %21 = arith.cmpi ne, %20, %c0_i32_16 : i32
    scf.if %21 {
      %c9_62 = arith.constant 9 : index
      %c1_63 = arith.constant 1 : index
      %c0_64 = arith.constant 0 : index
      %58 = vector.load %arg6[%c9_62, %c1_63, %c0_64] : memref<10x10x256xbf16, #tpu.memory_space<vmem>>, vector<1x8x256xbf16>
      tpu.vector_store %arg6[%c9_62, %c1_63, %c0_64], %9 {strides = array<i32>} : memref<10x10x256xbf16, #tpu.memory_space<vmem>>, vector<1x8x256xbf16>,
    } else {
    }
    %cst_17 = arith.constant 0.000000e+00 : f32
    %22 = vector.broadcast %cst_17 : f32 to vector<64x64xf32>
    %c0_18 = arith.constant 0 : index
    %c0_19 = arith.constant 0 : index
    %c0_20 = arith.constant 0 : index
    %23 = vector.load %arg6[%c0_18, %c0_19, %c0_20] : memref<10x10x256xbf16, #tpu.memory_space<vmem>>, vector<8x8x256xbf16>
    %c0_21 = arith.constant 0 : index
    %c1_22 = arith.constant 1 : index
    %c0_23 = arith.constant 0 : index
    %24 = vector.load %arg6[%c0_21, %c1_22, %c0_23] : memref<10x10x256xbf16, #tpu.memory_space<vmem>>, vector<8x8x256xbf16>
    %c0_24 = arith.constant 0 : index
    %c2 = arith.constant 2 : index
    %c0_25 = arith.constant 0 : index
    %25 = vector.load %arg6[%c0_24, %c2, %c0_25] : memref<10x10x256xbf16, #tpu.memory_space<vmem>>, vector<8x8x256xbf16>
    %26 = tpu.concatenate %23, %24, %25 in 2 : vector<8x8x256xbf16>, vector<8x8x256xbf16>, vector<8x8x256xbf16> -> vector<8x8x768xbf16>
    %27 = vector.shape_cast %26 : vector<8x8x768xbf16> to vector<64x768xbf16>
    %c0_26 = arith.constant 0 : index
    %c0_27 = arith.constant 0 : index
    %c0_28 = arith.constant 0 : index
    %28 = vector.load %arg3[%c0_26, %c0_27, %c0_28] : memref<3x768x64xbf16, #tpu.memory_space<vmem>>, vector<1x768x64xbf16>
    %29 = vector.shape_cast %28 : vector<1x768x64xbf16> to vector<768x64xbf16>
    %cst_29 = arith.constant dense<0.000000e+00> : vector<64x64xf32>
    %30 = tpu.matmul %27, %29, %cst_29 {dimension_numbers = #tpu.dot_dimension_numbers<[1], [0], [0], [1], [0, 0, 1, 1], [], []>} : vector<64x768xbf16>, vector<768x64xbf16>, vector<64x64xf32> -> vector<64x64xf32>
    %31 = arith.addf %22, %30 : vector<64x64xf32>
    %c1_30 = arith.constant 1 : index
    %c0_31 = arith.constant 0 : index
    %c0_32 = arith.constant 0 : index
    %32 = vector.load %arg6[%c1_30, %c0_31, %c0_32] : memref<10x10x256xbf16, #tpu.memory_space<vmem>>, vector<8x8x256xbf16>
    %c1_33 = arith.constant 1 : index
    %c1_34 = arith.constant 1 : index
    %c0_35 = arith.constant 0 : index
    %33 = vector.load %arg6[%c1_33, %c1_34, %c0_35] : memref<10x10x256xbf16, #tpu.memory_space<vmem>>, vector<8x8x256xbf16>
    %c1_36 = arith.constant 1 : index
    %c2_37 = arith.constant 2 : index
    %c0_38 = arith.constant 0 : index
    %34 = vector.load %arg6[%c1_36, %c2_37, %c0_38] : memref<10x10x256xbf16, #tpu.memory_space<vmem>>, vector<8x8x256xbf16>
    %35 = tpu.concatenate %32, %33, %34 in 2 : vector<8x8x256xbf16>, vector<8x8x256xbf16>, vector<8x8x256xbf16> -> vector<8x8x768xbf16>
    %36 = vector.shape_cast %35 : vector<8x8x768xbf16> to vector<64x768xbf16>
    %c1_39 = arith.constant 1 : index
    %c0_40 = arith.constant 0 : index
    %c0_41 = arith.constant 0 : index
    %37 = vector.load %arg3[%c1_39, %c0_40, %c0_41] : memref<3x768x64xbf16, #tpu.memory_space<vmem>>, vector<1x768x64xbf16>
    %38 = vector.shape_cast %37 : vector<1x768x64xbf16> to vector<768x64xbf16>
    %cst_42 = arith.constant dense<0.000000e+00> : vector<64x64xf32>
    %39 = tpu.matmul %36, %38, %cst_42 {dimension_numbers = #tpu.dot_dimension_numbers<[1], [0], [0], [1], [0, 0, 1, 1], [], []>} : vector<64x768xbf16>, vector<768x64xbf16>, vector<64x64xf32> -> vector<64x64xf32>
    %40 = arith.addf %31, %39 : vector<64x64xf32>
    %c2_43 = arith.constant 2 : index
    %c0_44 = arith.constant 0 : index
    %c0_45 = arith.constant 0 : index
    %41 = vector.load %arg6[%c2_43, %c0_44, %c0_45] : memref<10x10x256xbf16, #tpu.memory_space<vmem>>, vector<8x8x256xbf16>
    %c2_46 = arith.constant 2 : index
    %c1_47 = arith.constant 1 : index
    %c0_48 = arith.constant 0 : index
    %42 = vector.load %arg6[%c2_46, %c1_47, %c0_48] : memref<10x10x256xbf16, #tpu.memory_space<vmem>>, vector<8x8x256xbf16>
    %c2_49 = arith.constant 2 : index
    %c2_50 = arith.constant 2 : index
    %c0_51 = arith.constant 0 : index
    %43 = vector.load %arg6[%c2_49, %c2_50, %c0_51] : memref<10x10x256xbf16, #tpu.memory_space<vmem>>, vector<8x8x256xbf16>
    %44 = tpu.concatenate %41, %42, %43 in 2 : vector<8x8x256xbf16>, vector<8x8x256xbf16>, vector<8x8x256xbf16> -> vector<8x8x768xbf16>
    %45 = vector.shape_cast %44 : vector<8x8x768xbf16> to vector<64x768xbf16>
    %c2_52 = arith.constant 2 : index
    %c0_53 = arith.constant 0 : index
    %c0_54 = arith.constant 0 : index
    %46 = vector.load %arg3[%c2_52, %c0_53, %c0_54] : memref<3x768x64xbf16, #tpu.memory_space<vmem>>, vector<1x768x64xbf16>
    %47 = vector.shape_cast %46 : vector<1x768x64xbf16> to vector<768x64xbf16>
    %cst_55 = arith.constant dense<0.000000e+00> : vector<64x64xf32>
    %48 = tpu.matmul %45, %47, %cst_55 {dimension_numbers = #tpu.dot_dimension_numbers<[1], [0], [0], [1], [0, 0, 1, 1], [], []>} : vector<64x768xbf16>, vector<768x64xbf16>, vector<64x64xf32> -> vector<64x64xf32>
    %49 = arith.addf %40, %48 : vector<64x64xf32>
    %c0_56 = arith.constant 0 : index
    %c0_57 = arith.constant 0 : index
    %50 = vector.load %arg4[%c0_56, %c0_57] : memref<1x64xf32, #tpu.memory_space<vmem>>, vector<1x64xf32>
    %51 = vector.broadcast %50 : vector<1x64xf32> to vector<64x64xf32>
    %52 = arith.addf %49, %51 : vector<64x64xf32>
    %53 = vector.shape_cast %52 : vector<64x64xf32> to vector<8x8x64xf32>
    %54 = arith.truncf %53 : vector<8x8x64xf32> to vector<8x8x64xbf16>
    %c0_58 = arith.constant 0 : index
    %c0_59 = arith.constant 0 : index
    %c0_60 = arith.constant 0 : index
    %c0_61 = arith.constant 0 : index
    %55 = vector.load %arg5[%c0_58, %c0_59, %c0_60, %c0_61] : memref<1x8x8x64xbf16, #tpu.memory_space<vmem>>, vector<1x8x8x64xbf16>
    %56 = vector.shape_cast %55 : vector<1x8x8x64xbf16> to vector<8x8x64xbf16>
    %57 = vector.shape_cast %54 : vector<8x8x64xbf16> to vector<1x8x8x64xbf16>
    tpu.vector_store %arg5[%c0_58, %c0_59, %c0_60, %c0_61], %57 {strides = array<i32>} : memref<1x8x8x64xbf16, #tpu.memory_space<vmem>>, vector<1x8x8x64xbf16>,
    return
  }
  func.func @transform_0(%arg0: i32, %arg1: i32) -> (i32, i32, i32, i32) {
    %c0_i32 = arith.constant 0 : i32
    %c0_i32_0 = arith.constant 0 : i32
    %c0_i32_1 = arith.constant 0 : i32
    %c0_i32_2 = arith.constant 0 : i32
    return %arg0, %c0_i32, %c0_i32_0, %c0_i32_1 : i32, i32, i32, i32
  }
  func.func @transform_1(%arg0: i32, %arg1: i32) -> (i32, i32, i32) {
    %c0_i32 = arith.constant 0 : i32
    %c0_i32_0 = arith.constant 0 : i32
    %c0_i32_1 = arith.constant 0 : i32
    %c0_i32_2 = arith.constant 0 : i32
    return %c0_i32, %c0_i32_0, %c0_i32_1 : i32, i32, i32
  }
  func.func @transform_2(%arg0: i32, %arg1: i32) -> (i32, i32) {
    %c0_i32 = arith.constant 0 : i32
    %c0_i32_0 = arith.constant 0 : i32
    %c0_i32_1 = arith.constant 0 : i32
    return %c0_i32, %c0_i32_0 : i32, i32
  }
  func.func @transform_3(%arg0: i32, %arg1: i32) -> (i32, i32, i32, i32) {
    %c0_i32 = arith.constant 0 : i32
    %c0_i32_0 = arith.constant 0 : i32
    %c0_i32_1 = arith.constant 0 : i32
    return %arg0, %arg1, %c0_i32, %c0_i32_0 : i32, i32, i32, i32
  }
}

</mosaic_0001>

<bundles_post_ra>
// kernel: tpu_custom_call.1
= control target key start
LH: loop header
LB: loop body
LE: loop exit
PB: predicated region body
PF: predicated region fallthrough
CT: control target
= control target key end

     0   :  { %8 = vsyncpa [#allocation4], 0  ;;  %s5626_s0 = inlined_call_operand.vmem [shape: bf16[2,8,8,256], index: 0, kind: input, shape index: {}]   ;;  %s5627_s1 = inlined_call_operand.vmem [shape: bf16[3,768,64], index: 1, kind: input, shape index: {}]   ;;  %s5628_s2 = inlined_call_operand.vmem [shape: f32[1,64], index: 2, kind: input, shape index: {}]   ;;  %s5629_s3 = inlined_call_operand.hbm [shape: bf16[2,8,8,64], index: 3, kind: output, shape index: {}]  }
   0x1   :  { %10 = vsyncpa [#allocation4 + $0x1], 0  ;;  %s4648_s12 = smov 0   ;;  %s4650_s13 = smov 0  }
   0x2   :  { %s4652_s14 = smov 0   ;;  %s4654_s15 = smov 0  }
   0x3   :  { %s4656_s16 = smov 0   ;;  %s4658_s17 = smov 0  }
   0x4 LB: > { %s3359_s18 = sadd.s32 4294967295, %s4623_s17   ;;  %s3360_s19 = sadd.s32 4294967294, %s4623_s17   ;;  %s4623_s17 = sphi %s4658_s17, %s16_s17   ;;  %s4619_s16 = sphi %s4656_s16, %s5642_s16   ;;  %s4615_s15 = sphi %s4654_s15, %s5641_s15   ;;  %s4611_s14 = sphi %s4652_s14, %s5640_s14   ;;  %s4607_s13 = sphi %s4650_s13, %s5639_s13   ;;  %s4603_s12 = sphi %s4648_s12, %s5638_s12  }
   0x5   : > { %s28_s20 = sadd.s32 1, %s4619_s16  ;;  %s105_s21 = sadd.s32 1, %s4611_s14 }
   0x6   : > { %p30_p0 = scmp.ge.s32.totalorder %s28_s20, 2  ;;  %p115_p1 = scmp.ne.s32.totalorder %s4611_s14, %s4607_s13 }
   0x7   : > { %p116_p2 = scmp.eq.s32.totalorder %s3359_s18, 1  ;;  %p121_p3 = scmp.ne.s32.totalorder %s4607_s13, %s4603_s12 }
   0x8   : > { %s5644_s20 = smov (%p30_p0, %s28_s20), 0  ;;  %p122_p5 = scmp.eq.s32.totalorder %s3360_s19, 1 }
   0x9   : > { %p4688_p4 = por %p116_p2, %p115_p1  ;;  %s100_s23 = ssub.s32 %s4619_s16, %s5644_s20 }
   0xa   : > { %p3363_p6 = scmp.ge.s32.totalorder %s4623_s17, 1  ;;  %p103_p7 = scmp.eq.s32.totalorder %s100_s23, 0 }
   0xb   : > { %p4695_p8 = por %p122_p5, %p121_p3  ;;  %p154_p9 = scmp.lt.s32.totalorder %s4623_s17, 3 }
   0xc   : > { %s4701_s25 = scalar_select %p103_p7, %s4611_s14, %s105_s21  }
   0xd   : > { %p155_p10 = pnand %p3363_p6, %p154_p9 }
   0xe   : > { %v4314_v0 = vld [vmem:[%s5627_s1 + $0x1c0] sm:$0xff] (!%p155_p10)   ;;  %v4316_v2 = vld [vmem:[%s5627_s1 + $0x1c8] sm:$0xff] (!%p155_p10)   ;;  %v4320_v6 = vld [vmem:[%s5627_s1 + $0x1d0] sm:$0xff] (!%p155_p10)   ;;  %p178_p11 = scmp.lt.s32.totalorder (!%p155_p10), %s4615_s15, 1  ;;  %vm278_vm0 = vcmask (!%p155_p10), 1043456   ;;  %vm281_vm1 = vcmask (!%p155_p10), 1047556  }
   0xf   : > { %158 = sbr.rel (%p155_p10) target bundleno = 471 (0x1d7), region = 32  ;;  %v4315_v1 = vld [vmem:[%s5627_s1 + $0x180] sm:$0xff] (!%p155_p10)   ;;  %3881 = vmatprep.subr.bf16.mxu0 (!%p155_p10), %v4314_v0  ;;  %v4317_v3 = vld [vmem:[%s5627_s1 + $0x188] sm:$0xff] (!%p155_p10)   ;;  %v4321_v7 = vld [vmem:[%s5627_s1 + $0x190] sm:$0xff] (!%p155_p10)   ;;  %vm288_vm2 = vcmask (!%p155_p10), 1040384   ;;  %vm291_vm3 = vcmask (!%p155_p10), 1044484  }
  0x10   : > { %3882 = vmatpush3.bf16.msra.mxu0 (!%p155_p10), %v4315_v1  ;;  %v4318_v4 = vld [vmem:[%s5627_s1 + $0x240] sm:$0xff] (!%p155_p10)   ;;  %v4322_v8 = vld [vmem:[%s5627_s1 + $0x248] sm:$0xff] (!%p155_p10)   ;;  %v4324_v10 = vld [vmem:[%s5627_s1 + $0x1d8] sm:$0xff] (!%p155_p10)   ;;  %vm279_vm4 = vsmask.f32 (!%p155_p10), 7938  ;;  %s175_s6 = sand.u32 (!%p155_p10), 1, %s4607_s13  }
  0x11   : > { %3883 = vmatprep.subr.bf16.mxu0 (!%p155_p10), %v4316_v2  ;;  %v4319_v5 = vld [vmem:[%s5627_s1 + $0x200] sm:$0xff] (!%p155_p10)   ;;  %3921 = vmatprep.subr.bf16.mxu1 (!%p155_p10), %v4318_v4  ;;  %v4323_v9 = vld [vmem:[%s5627_s1 + $0x208] sm:$0xff] (!%p155_p10)   ;;  %v4325_v11 = vld [vmem:[%s5627_s1 + $0x198] sm:$0xff] (!%p155_p10)   ;;  %vm282_vm5 = vsmask.f32 (!%p155_p10), 7954  ;;  %s3364_s8 = sshll.u32 (!%p155_p10), %s175_s6, 5 }
  0x12   : > { %3922 = vmatpush3.bf16.msra.mxu1 (!%p155_p10), %v4319_v5  ;;  %v4326_v12 = vld [vmem:[%s5627_s1 + $0x250] sm:$0xff] (!%p155_p10)   ;;  %v4328_v14 = vld [vmem:[%s5627_s1 + $0x1e0] sm:$0xff] (!%p155_p10)   ;;  %v4330_v16 = vld [vmem:[%s5627_s1 + $0x258] sm:$0xff] (!%p155_p10)   ;;  %vm289_vm8 = vsmask.f32 (!%p155_p10), 256  ;;  %s5539_s9 = scalar_lea.vmem (!%p155_p10), [#allocation3], %s3364_s8 }
  0x13   : > { %3923 = vmatprep.subr.bf16.mxu1 (!%p155_p10), %v4322_v8  ;;  %v4327_v13 = vld [vmem:[%s5627_s1 + $0x210] sm:$0xff] (!%p155_p10)   ;;  %v4329_v15 = vld [vmem:[%s5627_s1 + $0x1a0] sm:$0xff] (!%p155_p10)   ;;  %v4331_v17 = vld [vmem:[%s5627_s1 + $0x218] sm:$0xff] (!%p155_p10)   ;;  %vm292_vm9 = vsmask.f32 (!%p155_p10), 4352  ;;  %s3880_s10 = sshll.u32 (!%p155_p10), %s4615_s15, 9 }
  0x14   : > { %3884 = vmatpush3.bf16.msra.mxu0 (!%p155_p10), %v4317_v3  ;;  %v4332_v18 = vld [vmem:[%s5627_s1 + $0x1e8] sm:$0xff] (!%p155_p10)   ;;  %v4334_v20 = vld [vmem:[%s5627_s1 + $0x260] sm:$0xff] (!%p155_p10)   ;;  %v4336_v22 = vld [vmem:[%s5627_s1 + $0x1f0] sm:$0xff] (!%p155_p10)   ;;  %s3278_s11 = sshll.u32 (!%p155_p10), %s5539_s9, 4  ;;  %s4625_s26 = smov (!%p155_p10), [#allocation3]   ;;  %s5572_s11 = int_to_ptr.vmem [resolvable:$true] %s3278_s11 }
  0x15   : > { %3885 = vmatprep.subr.bf16.mxu0 (!%p155_p10), %v4320_v6  ;;  %v4333_v19 = vld [vmem:[%s5627_s1 + $0x1a8] sm:$0xff] (!%p155_p10)   ;;  %v4335_v21 = vld [vmem:[%s5627_s1 + $0x220] sm:$0xff] (!%p155_p10)   ;;  %v4337_v23 = vld [vmem:[%s5627_s1 + $0x1b0] sm:$0xff] (!%p155_p10)   ;;  %s4545_s23 = scalar_lea.vmem (!%p155_p10), %s5572_s11, 512  ;;  %s4549_s27 = sshll.u32 (!%p155_p10), %s4625_s26, 4  ;;  %s4550_s27 = int_to_ptr.vmem [resolvable:$false] %s4549_s27 }
  0x16   : > { %3924 = vmatpush3.bf16.msra.mxu1 %v4323_v9  ;;  %s179_s5 = scalar_select %p178_p11, %s4615_s15, 1  ;;  %v4338_v24 = vld [vmem:[%s5627_s1 + $0x268] sm:$0xff]   ;;  %v4340_v26 = vld [vmem:[%s5627_s1 + $0x1f8] sm:$0xff]   ;;  %v4342_v28 = vld [vmem:[%s5627_s1 + $0x270] sm:$0xff]  }
  0x17   : > { %3925 = vmatprep.subr.bf16.mxu1 %v4326_v12  ;;  %v4339_v25 = vld [vmem:[%s5627_s1 + $0x228] sm:$0xff]   ;;  %v4341_v27 = vld [vmem:[%s5627_s1 + $0x1b8] sm:$0xff]   ;;  %vm280_vm6 = vmand %vm278_vm0, %vm279_vm4  ;;  %s5580_s15 = scalar_lea.sflag [#allocation4], %s175_s6  ;;  %p4546_p12 = scmp.ne.s32.totalorder %s5572_s11, %s4545_s23 }
  0x18   : > { %3886 = vmatpush3.bf16.msra.mxu0 %v4321_v7  ;;  %s3879_s21 = sshll.u32 %s179_s5, 6  ;;  %vm283_vm7 = vmand %vm281_vm1, %vm282_vm5  ;;  %v285_v35 = vld [vmem:[#allocation2 + $0x10] sm:$0xff]  ;;  %v295_v36 = vld [vmem:[#allocation2 + $0x18] sm:$0x11]  ;;  %vm3253_vm1 = vcmask 519168   ;;  %s4551_s28 = scalar_lea.vmem %s4550_s27, 1024 }
  0x19   : > { %3887 = vmatprep.subr.bf16.mxu0 %v4324_v10  ;;  %s4789_s7 = scalar_lea.vmem %s5626_s0, %s3879_s21  ;;  %v298_v37 = vld [vmem:[#allocation2 + $0x20] sm:$0xff]  ;;  %vm4803_vm10 = vmor %vm283_vm7, %vm280_vm6  ;;  %v301_v41 = vld [vmem:[#allocation2 + $0x28] sm:$0x11]  ;;  %s5570_s21 = scalar_lea.hbm %s5629_s3, %s3880_s10 }
  0x1a   : > { %3926 = vmatpush3.bf16.msra.mxu1 %v4327_v13  ;;  %v189_v29 = vld [vmem:[%s4789_s7] sm:$0xff]  ;;  %v190_v30 = vld [vmem:[%s4789_s7 + $0x8] sm:$0xff]  ;;  %vm290_vm11 = vmand %vm288_vm2, %vm289_vm8  ;;  %p4547_p13 = pnand %p4546_p12, %p4688_p4  ;;  %p4552_p1 = scmp.lt.s32.totalorder %s5572_s11, %s4550_s27 }
  0x1b   : > { %3927 = vmatprep.subr.bf16.mxu1 %v4330_v16  ;;  %v198_v31 = vshrl.u32 %v189_v29, 16  ;;  %v201_v32 = vshll.u32 %v189_v29, 16  ;;  %v206_v33 = vshrl.u32 %v190_v30, 16  ;;  %v209_v34 = vshll.u32 %v190_v30, 16  ;;  %v4346_v42 = vld [vmem:[%s5627_s1 + $0x230] sm:$0xff]   ;;  %vm293_vm12 = vmand %vm291_vm3, %vm292_vm9  ;;  %v4348_v48 = vld [vmem:[%s5627_s1 + $0x2c0] sm:$0xff]   ;;  %p4553_p2 = scmp.lt.s32.totalorder %s4551_s28, %s4545_s23 }
  0x1c   : > { %3888 = vmatpush3.bf16.msra.mxu0 %v4325_v11  ;;  %vm4812_vm13 = vmor %vm293_vm12, %vm290_vm11  ;;  %v4350_v53 = vld [vmem:[%s5627_s1 + $0x278] sm:$0xff]   ;;  %v4356_v56 = vld [vmem:[%s5627_s1 + $0x40] sm:$0xff]   ;;  %p4548_p0 = pneg %p4547_p13 }
  0x1d   : > { %3889 = vmatprep.subr.bf16.mxu0 %v4328_v14  ;;  %v200_v38 = vrot.slane %v198_v31, 7  ;;  %v208_v39 = vrot.slane %v206_v33, 7  ;;  %vm370_vm14 = vmand %vm288_vm2, %vm279_vm4  ;;  %v4351_v54 = vld [vmem:[%s5627_s1 + $0x238] sm:$0xff]   ;;  %v191_v57 = vld [vmem:[%s4789_s7 + $0x10] sm:$0xff]  ;;  %p4554_p3 = por %p4553_p2, %p4552_p1 }
  0x1e   : > { %3928 = vmatpush3.bf16.msra.mxu1 %v4331_v17  ;;  %vm371_vm15 = vmand %vm291_vm3, %vm282_vm5  ;;  %v192_v58 = vld [vmem:[%s4789_s7 + $0x18] sm:$0xff]  ;;  %v214_v59 = vshrl.u32 %v191_v57, 16  ;;  %v217_v60 = vshll.u32 %v191_v57, 16  ;;  %v304_v8 = vld [vmem:[#allocation2 + $0x30] sm:$0xff] }
  0x1f   : > { %3929 = vmatprep.subr.bf16.mxu1 %v4334_v20  ;;  %v203_v43 = vor.u32 %v201_v32, %v200_v38  ;;  %v204_v44 = vrot.slane %v200_v38, 4  ;;  %v211_v45 = vor.u32 %v209_v34, %v208_v39  ;;  %v212_v46 = vrot.slane %v208_v39, 4  ;;  %vm4837_vm0 = vmor %vm371_vm15, %vm370_vm14  ;;  %v310_v11 = vld [vmem:[#allocation2 + $0x40] sm:$0xff]  ;;  %v313_v31 = vld [vmem:[#allocation2 + $0x48] sm:$0x11]  ;;  %p4555_p5 = pnand %p4554_p3, %p4548_p0 }
  0x20   : > { %3890 = vmatpush3.bf16.msra.mxu0 %v4329_v15  ;;  %v216_v4 = vrot.slane %v214_v59, 7  ;;  %v222_v6 = vshrl.u32 %v192_v58, 16  ;;  %v225_v7 = vshll.u32 %v192_v58, 16  ;;  %v4349_v15 = vld [vmem:[%s5627_s1 + $0x280] sm:$0xff]   ;;  %v4522_v40 = vld [vmem:[%s5627_s1 + $0x478] sm:$0xff]  }
  0x21   : > { %3891 = vmatprep.subr.bf16.mxu0 %v4332_v18  ;;  %v286_v49 = vsel %vm4803_vm10, %v203_v43, %v285_v35  ;;  %v296_v50 = vsel %vm4812_vm13, %v204_v44, %v295_v36  ;;  %v299_v51 = vsel %vm4803_vm10, %v211_v45, %v298_v37  ;;  %v302_v52 = vsel %vm4812_vm13, %v212_v46, %v301_v41  ;;  %v193_v36 = vld [vmem:[%s4789_s7 + $0x20] sm:$0xff]  ;;  %v4353_v43 = vld [vmem:[%s5627_s1 + $0x288] sm:$0xff]  }
  0x22   : > { %3930 = vmatpush3.bf16.msra.mxu1 %v4335_v21  ;;  %287 = vst [vmem:[#allocation2 + $0x10] sm:$0xff] %v286_v49  ;;  %297 = vst [vmem:[#allocation2 + $0x18] sm:$0x11] %v296_v50  ;;  %v219_v9 = vor.u32 %v217_v60, %v216_v4  ;;  %v224_v10 = vrot.slane %v222_v6, 7  ;;  %v220_v14 = vrot.slane %v216_v4, 4  ;;  %v194_v50 = vld [vmem:[%s4789_s7 + $0x28] sm:$0xff] }
  0x23   : > { %3931 = vmatprep.subr.bf16.mxu1 %v4338_v24  ;;  %300 = vst [vmem:[#allocation2 + $0x20] sm:$0xff] %v299_v51  ;;  %303 = vst [vmem:[#allocation2 + $0x28] sm:$0x11] %v302_v52  ;;  %v238_v59 = vshrl.u32 %v194_v50, 16  ;;  %v241_v60 = vshll.u32 %v194_v50, 16 }
  0x24   : > { %3892 = vmatpush3.bf16.msra.mxu0 %v4333_v19  ;;  %v305_v12 = vsel %vm4803_vm10, %v219_v9, %v304_v8  ;;  %v227_v13 = vor.u32 %v225_v7, %v224_v10  ;;  %v228_v20 = vrot.slane %v224_v10, 4  ;;  %v322_v10 = vld [vmem:[#allocation2 + $0x60] sm:$0xff] }
  0x25   : > { %3893 = vmatprep.subr.bf16.mxu0 %v4336_v22  ;;  %306 = vst [vmem:[#allocation2 + $0x30] sm:$0xff] %v305_v12  ;;  %v240_v4 = vrot.slane %v238_v59, 7 }
  0x26   : > { %3932 = vmatpush3.bf16.msra.mxu1 %v4339_v25  ;;  %v311_v16 = vsel %vm4803_vm10, %v227_v13, %v310_v11  ;;  %v4352_v25 = vld [vmem:[%s5627_s1 + $0x2c8] sm:$0xff]   ;;  %v314_v49 = vsel %vm4812_vm13, %v228_v20, %v313_v31  ;;  %v4368_v31 = vld [vmem:[%s5627_s1 + $0x10] sm:$0xff]  }
  0x27   : > { %3933 = vmatprep.subr.bf16.mxu1 %v4342_v28  ;;  %312 = vst [vmem:[#allocation2 + $0x40] sm:$0xff] %v311_v16  ;;  %315 = vst [vmem:[#allocation2 + $0x48] sm:$0x11] %v314_v49  ;;  %v4362_v11 = vld [vmem:[%s5627_s1 + $0x48] sm:$0xff]   ;;  %v243_v13 = vor.u32 %v241_v60, %v240_v4 }
  0x28   : > { %3894 = vmatpush3.bf16.msra.mxu0 %v4337_v23 }
  0x29   : > { %3895 = vmatprep.subr.bf16.mxu0 %v4340_v26  ;;  %v343_v61 = vld [vmem:[#allocation2 + $0x10] sm:$0x11]  ;;  %v376_v63 = vld [vmem:[#allocation2 + $0x18] sm:$0x11] }
  0x2a   : > { %3934 = vmatpush3.bf16.msra.mxu1 %v4346_v42  ;;  %v346_v62 = vld [vmem:[#allocation2 + $0x20] sm:$0x11]  ;;  %v344_v0 = vsel %vm4812_vm13, 0, %v343_v61  ;;  %v377_v2 = vsel %vm4837_vm0, 0, %v376_v63  ;;  %v379_v3 = vld [vmem:[#allocation2 + $0x28] sm:$0x11] }
  0x2b   : > { %3935 = vmatprep.subr.bf16.mxu1 %v4350_v53  ;;  %v347_v1 = vsel %vm4812_vm13, 0, %v346_v62  ;;  %345 = vst [vmem:[#allocation2 + $0x10] sm:$0x11] %v344_v0  ;;  %378 = vst [vmem:[#allocation2 + $0x18] sm:$0x11] %v377_v2  ;;  %v380_v5 = vsel %vm4837_vm0, 0, %v379_v3 }
  0x2c   : > { %3896 = vmatpush3.bf16.msra.mxu0 %v4341_v27  ;;  %348 = vst [vmem:[#allocation2 + $0x20] sm:$0x11] %v347_v1  ;;  %381 = vst [vmem:[#allocation2 + $0x28] sm:$0x11] %v380_v5  ;;  %v307_v27 = vld [vmem:[#allocation2 + $0x38] sm:$0x11] }
  0x2d   : > { %3961 = vmatprep.subr.bf16.mxu0 %v4348_v48  ;;  %v308_v30 = vsel %vm4812_vm13, %v220_v14, %v307_v27  ;;  %v349_v39 = vld [vmem:[#allocation2 + $0x30] sm:$0x11]  ;;  %v230_v53 = vshrl.u32 %v193_v36, 16  ;;  %v4358_v0 = vld [vmem:[%s5627_s1] sm:$0xff]   ;;  %v4364_v2 = vld [vmem:[%s5627_s1 + $0x2d8] sm:$0xff]  }
  0x2e   : > { %3936 = vmatpush3.bf16.msra.mxu1 %v4351_v54  ;;  %309 = vst [vmem:[#allocation2 + $0x38] sm:$0x11] %v308_v30  ;;  %v350_v45 = vsel %vm4812_vm13, 0, %v349_v39  ;;  %v4360_v48 = vld [vmem:[%s5627_s1 + $0x2d0] sm:$0xff]   ;;  %v233_v54 = vshll.u32 %v193_v36, 16  ;;  %v4363_v14 = vld [vmem:[%s5627_s1 + $0x8] sm:$0xff]  }
  0x2f   : > { %4001 = vmatprep.subr.bf16.mxu1 %v4356_v56  ;;  %351 = vst [vmem:[#allocation2 + $0x30] sm:$0x11] %v350_v45  ;;  %v352_v57 = vld [vmem:[#allocation2 + $0x40] sm:$0x11]  ;;  %v4361_v1 = vld [vmem:[%s5627_s1 + $0x290] sm:$0xff]   ;;  %v232_v3 = vrot.slane %v230_v53, 7 }
  0x30   : > { %v353_v62 = vsel %vm4812_vm13, 0, %v352_v57  ;;  %v316_v5 = vld [vmem:[#allocation2 + $0x50] sm:$0xff]  ;;  %v4371_v36 = vld [vmem:[%s5627_s1 + $0x2a0] sm:$0xff]   ;;  %v4372_v39 = vld [vmem:[%s5627_s1 + $0x58] sm:$0xff]  }
  0x31   : > { %354 = vst [vmem:[#allocation2 + $0x40] sm:$0x11] %v353_v62  ;;  %v235_v9 = vor.u32 %v233_v54, %v232_v3  ;;  %v236_v16 = vrot.slane %v232_v3, 4  ;;  %v4375_v45 = vld [vmem:[%s5627_s1 + $0x2a8] sm:$0xff]  }
  0x32   : > { %v4861_v17 = vld [vmem:[#allocation2 + $0x10] sm:$0xff]  ;;  %v4865_v19 = vld [vmem:[#allocation2 + $0x18] sm:$0x11] }
  0x33   : > { %v4863_v18 = vld [vmem:[#allocation2 + $0x20] sm:$0xff]  ;;  %v4867_v21 = vld [vmem:[#allocation2 + $0x28] sm:$0x11]  ;;  %v3401_v22 = vcombine.low %v4861_v17, %v4865_v19  ;;  %v3402_v26 = vcombine.high %v4861_v17, %v4865_v19  ;;  %v317_v20 = vsel %vm4803_vm10, %v235_v9, %v316_v5 }
  0x34   : > { %v3530_v23 = vcombine.high %v4861_v17, %v4863_v18  ;;  %v3529_v24 = vcombine.low %v4861_v17, %v4863_v18  ;;  %v3403_v28 = vcombine.low %v4863_v18, %v4867_v21  ;;  %v3404_v29 = vcombine.high %v4863_v18, %v4867_v21  ;;  %318 = vst [vmem:[#allocation2 + $0x50] sm:$0xff] %v317_v20 }
  0x35   : > { %v954_v32 = vshrl.u32 %v3402_v26, 16  ;;  %v956_v33 = vshll.u32 %v3402_v26, 16  ;;  %v947_v34 = vshrl.u32 %v3401_v22, 16  ;;  %v949_v35 = vshll.u32 %v3401_v22, 16  ;;  %v382_v8 = vld [vmem:[#allocation2 + $0x38] sm:$0x11] }
  0x36   : > { %1611 = vmatprep.mubr.bf16.mxu0 %v3530_v23  ;;  %v968_v37 = vshrl.u32 %v3404_v29, 16  ;;  %v970_v38 = vshll.u32 %v3404_v29, 16  ;;  %v961_v41 = vshrl.u32 %v3403_v28, 16  ;;  %v963_v42 = vshll.u32 %v3403_v28, 16  ;;  %v385_v22 = vld [vmem:[#allocation2 + $0x48] sm:$0x11] }
  0x37   : > { %1612 = vmatmul.mubr.bf16.vlgmr.msra.gmra.mrb[0].mxu0 %v3529_v24  ;;  %v958_v44 = vrot.slane %v956_v33, 1  ;;  %v951_v46 = vrot.slane %v949_v35, 1  ;;  %v383_v12 = vsel %vm4837_vm0, 0, %v382_v8  ;;  %v244_v23 = vrot.slane %v240_v4, 4  ;;  %v4927_v26 = vld [vmem:[#allocation2 + $0x30] sm:$0xff] }
  0x38   : > { %3962 = vmatpush3.bf16.msra.mxu0 %v4349_v15  ;;  %v972_v51 = vrot.slane %v970_v38, 1  ;;  %v965_v52 = vrot.slane %v963_v42, 1  ;;  %v4365_v15 = vld [vmem:[%s5627_s1 + $0x298] sm:$0xff]   ;;  %384 = vst [vmem:[#allocation2 + $0x38] sm:$0x11] %v383_v12  ;;  %v323_v24 = vsel %vm4803_vm10, %v243_v13, %v322_v10  ;;  %v386_v27 = vsel %vm4837_vm0, 0, %v385_v22 }
  0x39   : > { %3963 = vmatprep.subr.bf16.mxu0 %v4352_v25  ;;  %v959_v56 = vor.u32 %v958_v44, %v954_v32  ;;  %v952_v58 = vor.u32 %v951_v46, %v947_v34  ;;  %v4370_v25 = vld [vmem:[%s5627_s1 + $0x2e0] sm:$0xff]   ;;  %324 = vst [vmem:[#allocation2 + $0x60] sm:$0xff] %v323_v24  ;;  %387 = vst [vmem:[#allocation2 + $0x48] sm:$0x11] %v386_v27  ;;  %v4366_v28 = vld [vmem:[%s5627_s1 + $0x50] sm:$0xff]  }
  0x3a   : > { %v973_v61 = vor.u32 %v972_v51, %v968_v37  ;;  %v966_v63 = vor.u32 %v965_v52, %v961_v41  ;;  %v319_v29 = vld [vmem:[#allocation2 + $0x58] sm:$0x11]  ;;  %v4934_v30 = vld [vmem:[#allocation2 + $0x40] sm:$0xff]  ;;  %v325_v33 = vld [vmem:[#allocation2 + $0x68] sm:$0x11] }
  0x3b   : > { %v320_v32 = vsel %vm4812_vm13, %v236_v16, %v319_v29  ;;  %v3536_v34 = vcombine.high %v4927_v26, %v4934_v30  ;;  %v3535_v35 = vcombine.low %v4927_v26, %v4934_v30  ;;  %v326_v37 = vsel %vm4812_vm13, %v244_v23, %v325_v33  ;;  %v195_v38 = vld [vmem:[%s4789_s7 + $0x30] sm:$0xff]  ;;  %v4374_v41 = vld [vmem:[%s5627_s1 + $0x2e8] sm:$0xff]   ;;  %v196_v42 = vld [vmem:[%s4789_s7 + $0x38] sm:$0xff] }
  0x3c   : > { %3964 = vmatpush3.bf16.msra.mxu0 %v4353_v43  ;;  %v3532_v6 = vcombine.low %v959_v56, %v973_v61  ;;  %v3531_v7 = vcombine.low %v952_v58, %v966_v63  ;;  %321 = vst [vmem:[#allocation2 + $0x58] sm:$0x11] %v320_v32  ;;  %327 = vst [vmem:[#allocation2 + $0x68] sm:$0x11] %v326_v37  ;;  %v246_v43 = vshrl.u32 %v195_v38, 16  ;;  %v249_v46 = vshll.u32 %v195_v38, 16 }
  0x3d   : > { %3965 = vmatprep.subr.bf16.mxu0 %v4360_v48  ;;  %1619 = vmatprep.mubr.bf16.mxu0 %v3536_v34  ;;  %v254_v48 = vshrl.u32 %v196_v42, 16  ;;  %v355_v50 = vld [vmem:[#allocation2 + $0x50] sm:$0x11]  ;;  %v4373_v52 = vld [vmem:[%s5627_s1 + $0x18] sm:$0xff]   ;;  %v257_v54 = vshll.u32 %v196_v42, 16  ;;  %v4376_v58 = vld [vmem:[%s5627_s1 + $0x60] sm:$0xff]  }
  0x3e   : > { %1676 = vmatprep.mubr.bf16.mxu1 %v3532_v6  ;;  %v4970_v53 = vrot.slane %v246_v43, 7  ;;  %v356_v56 = vsel %vm4812_vm13, 0, %v355_v50  ;;  %v4378_v13 = vld [vmem:[%s5627_s1 + $0x20] sm:$0xff]   ;;  %v4381_v22 = vld [vmem:[%s5627_s1 + $0x2b0] sm:$0xff]   ;;  %v4382_v33 = vld [vmem:[%s5627_s1 + $0x68] sm:$0xff]  }
  0x3f   : > { %1677 = vmatmul.mubr.bf16.vlgmr.msra.gmra.mrb[0].mxu1 %v3531_v7  ;;  %v4958_v44 = vld [vmem:[#allocation2 + $0x38] sm:$0x11]  ;;  %1620 = vmatmul.mubr.bf16.gmra.mrb[4].mxu0 %v3535_v35  ;;  %v4977_v59 = vrot.slane %v254_v48, 7  ;;  %357 = vst [vmem:[#allocation2 + $0x50] sm:$0x11] %v356_v56  ;;  %v4380_v7 = vld [vmem:[%s5627_s1 + $0x2f0] sm:$0xff]  }
  0x40   : > { %3966 = vmatpush3.bf16.msra.mxu0 %v4361_v1  ;;  %4002 = vmatpush3.bf16.msra.mxu1 %v4358_v0  ;;  %v3406_v49 = vcombine.high %v4927_v26, %v4958_v44  ;;  %v3405_v51 = vcombine.low %v4927_v26, %v4958_v44  ;;  %v358_v57 = vld [vmem:[#allocation2 + $0x60] sm:$0x11]  ;;  %v4979_v60 = vld [vmem:[#allocation2 + $0x48] sm:$0x11]  ;;  %v328_v1 = vld [vmem:[#allocation2 + $0x70] sm:$0xff]  ;;  %v251_v6 = vor.u32 %v249_v46, %v4970_v53  ;;  %v252_v10 = vrot.slane %v4970_v53, 4 }
  0x41   : > { %3967 = vmatprep.subr.bf16.mxu0 %v4364_v2  ;;  %4003 = vmatprep.subr.bf16.mxu1 %v4362_v11  ;;  %v359_v63 = vsel %vm4812_vm13, 0, %v358_v57  ;;  %v334_v2 = vld [vmem:[#allocation2 + $0x80] sm:$0xff]  ;;  %v3408_v3 = vcombine.high %v4934_v30, %v4979_v60  ;;  %v3407_v4 = vcombine.low %v4934_v30, %v4979_v60  ;;  %v259_v11 = vor.u32 %v257_v54, %v4977_v59  ;;  %v4385_v48 = vld [vmem:[%s5627_s1 + $0x2b8] sm:$0xff]   ;;  %v337_v50 = vld [vmem:[#allocation2 + $0x88] sm:$0x11] }
  0x42   : > { %v982_v61 = vshrl.u32 %v3406_v49, 16  ;;  %v984_v62 = vshll.u32 %v3406_v49, 16  ;;  %v975_v0 = vshrl.u32 %v3405_v51, 16  ;;  %360 = vst [vmem:[#allocation2 + $0x60] sm:$0x11] %v359_v63  ;;  %v977_v5 = vshll.u32 %v3405_v51, 16 }
  0x43   : > { %v388_v9 = vld [vmem:[#allocation2 + $0x58] sm:$0x11]  ;;  %v260_v12 = vrot.slane %v4977_v59, 4  ;;  %v391_v20 = vld [vmem:[#allocation2 + $0x68] sm:$0x11]  ;;  %v989_v23 = vshrl.u32 %v3407_v4, 16  ;;  %v335_v32 = vsel %vm4803_vm10, %v259_v11, %v334_v2 }
  0x44   : > { %3968 = vmatpush3.bf16.msra.mxu0 %v4365_v15  ;;  %4004 = vmatpush3.bf16.msra.mxu1 %v4363_v14  ;;  %v986_v8 = vrot.slane %v984_v62, 1  ;;  %v996_v14 = vshrl.u32 %v3408_v3, 16  ;;  %v998_v15 = vshll.u32 %v3408_v3, 16  ;;  %v979_v16 = vrot.slane %v977_v5, 1  ;;  %336 = vst [vmem:[#allocation2 + $0x80] sm:$0xff] %v335_v32  ;;  %v4386_v54 = vld [vmem:[%s5627_s1 + $0x70] sm:$0xff]  }
  0x45   : > { %3969 = vmatprep.subr.bf16.mxu0 %v4370_v25  ;;  %4005 = vmatprep.subr.bf16.mxu1 %v4366_v28  ;;  %v991_v24 = vshll.u32 %v3407_v4, 16  ;;  %v389_v25 = vsel %vm4837_vm0, 0, %v388_v9  ;;  %v392_v27 = vsel %vm4837_vm0, 0, %v391_v20  ;;  %v331_v49 = vld [vmem:[#allocation2 + $0x78] sm:$0x11]  ;;  %v338_v53 = vsel %vm4812_vm13, %v260_v12, %v337_v50  ;;  %v4391_v4 = vld [vmem:[%s5627_s1 + $0x30] sm:$0xff]  }
  0x46   : > { %v987_v28 = vor.u32 %v986_v8, %v982_v61  ;;  %v1000_v29 = vrot.slane %v998_v15, 1  ;;  %390 = vst [vmem:[#allocation2 + $0x58] sm:$0x11] %v389_v25  ;;  %393 = vst [vmem:[#allocation2 + $0x68] sm:$0x11] %v392_v27  ;;  %v980_v34 = vor.u32 %v979_v16, %v975_v0  ;;  %v5014_v38 = vld [vmem:[#allocation2 + $0x50] sm:$0xff] }
  0x47   : > { %v993_v35 = vrot.slane %v991_v24, 1  ;;  %339 = vst [vmem:[#allocation2 + $0x88] sm:$0x11] %v338_v53  ;;  %v5035_v56 = vld [vmem:[#allocation2 + $0x10] sm:$0xee]  ;;  %v4392_v8 = vld [vmem:[%s5627_s1 + $0xc0] sm:$0xff]  }
  0x48   : > { %3970 = vmatpush3.bf16.msra.mxu0 %v4371_v36  ;;  %4006 = vmatpush3.bf16.msra.mxu1 %v4368_v31  ;;  %v329_v31 = vsel %vm4803_vm10, %v251_v6, %v328_v1  ;;  %v4384_v36 = vld [vmem:[%s5627_s1 + $0x2f8] sm:$0xff]   ;;  %v1001_v37 = vor.u32 %v1000_v29, %v996_v14  ;;  %v5037_v57 = vld [vmem:[#allocation2 + $0x20] sm:$0xee]  ;;  %v3418_v61 = vcombine.high %v5035_v56, %v4865_v19  ;;  %v340_v53 = vld [vmem:[#allocation2] sm:$0x11] }
  0x49   : > { %3971 = vmatprep.subr.bf16.mxu0 %v4374_v41  ;;  %4007 = vmatprep.subr.bf16.mxu1 %v4372_v39  ;;  %330 = vst [vmem:[#allocation2 + $0x70] sm:$0xff] %v329_v31  ;;  %v4383_v39 = vld [vmem:[%s5627_s1 + $0x28] sm:$0xff]   ;;  %v5019_v41 = vld [vmem:[#allocation2 + $0x60] sm:$0xff]  ;;  %v994_v42 = vor.u32 %v993_v35, %v989_v23  ;;  %v3417_v29 = vcombine.low %v5035_v56, %v4865_v19  ;;  %v4394_v35 = vld [vmem:[%s5627_s1 + $0x78] sm:$0xff]   ;;  %v341_v56 = vsel %vm4812_vm13, 0, %v340_v53 }
  0x4a   : > { %v3538_v43 = vcombine.low %v987_v28, %v1001_v37  ;;  %v3541_v46 = vcombine.low %v5014_v38, %v5019_v41  ;;  %v1099_v23 = vrot.slane %v3418_v61, 1  ;;  %342 = vst [vmem:[#allocation2] sm:$0x11] %v341_v56  ;;  %v4399_v61 = vld [vmem:[%s5627_s1 + $0x140] sm:$0xff]   ;;  %v878_v56 = vld [vmem:[#allocation2 + $0x50] sm:$0xee] }
  0x4b   : > { %v3537_v51 = vcombine.low %v980_v34, %v994_v42  ;;  %v364_v1 = vld [vmem:[#allocation2 + $0x80] sm:$0x11]  ;;  %v4395_v42 = vld [vmem:[%s5627_s1 + $0x38] sm:$0xff]  }
  0x4c   : > { %3972 = vmatpush3.bf16.msra.mxu0 %v4375_v45  ;;  %4008 = vmatpush3.bf16.msra.mxu1 %v4373_v52  ;;  %v3542_v45 = vcombine.high %v5014_v38, %v5019_v41  ;;  %v332_v52 = vsel %vm4812_vm13, %v252_v10, %v331_v49  ;;  %v365_v6 = vsel %vm4812_vm13, 0, %v364_v1 }
  0x4d   : > { %3973 = vmatprep.subr.bf16.mxu0 %v4380_v7  ;;  %4009 = vmatprep.subr.bf16.mxu1 %v4376_v58  ;;  %333 = vst [vmem:[#allocation2 + $0x78] sm:$0x11] %v332_v52  ;;  %v5039_v58 = vld [vmem:[#allocation2 + $0x58] sm:$0x11]  ;;  %v5041_v59 = vld [vmem:[#allocation2 + $0x68] sm:$0x11]  ;;  %v3420_v7 = vcombine.high %v5037_v57, %v4867_v21 }
  0x4e   : > { %1684 = vmatprep.mubr.bf16.mxu1 %v3538_v43  ;;  %1627 = vmatprep.mubr.bf16.mxu0 %v3542_v45  ;;  %v3410_v62 = vcombine.high %v5014_v38, %v5039_v58  ;;  %v3412_v63 = vcombine.high %v5019_v41, %v5041_v59  ;;  %v3409_v2 = vcombine.low %v5014_v38, %v5039_v58  ;;  %v397_v28 = vld [vmem:[#allocation2 + $0x88] sm:$0x11] }
  0x4f   : > { %1685 = vmatmul.mubr.bf16.gmra.mrb[4].mxu1 %v3537_v51  ;;  %1628 = vmatmul.mubr.bf16.gmra.mrb[8].mxu0 %v3541_v46  ;;  %v3411_v3 = vcombine.low %v5019_v41, %v5041_v59  ;;  %366 = vst [vmem:[#allocation2 + $0x80] sm:$0x11] %v365_v6  ;;  %v398_v34 = vsel %vm4837_vm0, 0, %v397_v28  ;;  %v1101_v19 = vrot.slane %v3420_v7, 1 }
  0x50   : > { %3974 = vmatpush3.bf16.msra.mxu0 %v4381_v22  ;;  %4010 = vmatpush3.bf16.msra.mxu1 %v4378_v13  ;;  %v361_v0 = vld [vmem:[#allocation2 + $0x70] sm:$0x11]  ;;  %v1010_v9 = vshrl.u32 %v3410_v62, 16  ;;  %v1012_v10 = vshll.u32 %v3410_v62, 16  ;;  %v1024_v11 = vshrl.u32 %v3412_v63, 16  ;;  %v1026_v12 = vshll.u32 %v3412_v63, 16 }
  0x51   : > { %3975 = vmatprep.subr.bf16.mxu0 %v4384_v36  ;;  %4011 = vmatprep.subr.bf16.mxu1 %v4382_v33  ;;  %v362_v5 = vsel %vm4812_vm13, 0, %v361_v0  ;;  %v1003_v13 = vshrl.u32 %v3409_v2, 16  ;;  %v1005_v14 = vshll.u32 %v3409_v2, 16  ;;  %v1017_v15 = vshrl.u32 %v3411_v3, 16  ;;  %399 = vst [vmem:[#allocation2 + $0x88] sm:$0x11] %v398_v34 }
  0x52   : > { %363 = vst [vmem:[#allocation2 + $0x70] sm:$0x11] %v362_v5  ;;  %v1019_v16 = vshll.u32 %v3411_v3, 16  ;;  %v1014_v20 = vrot.slane %v1012_v10, 1  ;;  %v1028_v22 = vrot.slane %v1026_v12, 1  ;;  %v3534_v51 = vcombine.low %v1099_v23, %v1101_v19  ;;  %v432_v34 = vld [vmem:[#allocation2] sm:$0xff] }
  0x53   : > { %v1007_v24 = vrot.slane %v1005_v14, 1  ;;  %v876_v62 = vld [vmem:[#allocation2 + $0x30] sm:$0xee]  ;;  %v877_v63 = vld [vmem:[#allocation2 + $0x40] sm:$0xee]  ;;  %v433_v19 = vsel %vm4803_vm10, 0, %v432_v34 }
  0x54   : > { %4012 = vmatpush3.bf16.msra.mxu1 %v4383_v39  ;;  %3976 = vmatpush3.bf16.msra.mxu0 %v4385_v48  ;;  %v1021_v25 = vrot.slane %v1019_v16, 1  ;;  %v394_v27 = vld [vmem:[#allocation2 + $0x78] sm:$0x11]  ;;  %v1015_v31 = vor.u32 %v1014_v20, %v1010_v9  ;;  %v1029_v32 = vor.u32 %v1028_v22, %v1024_v11  ;;  %v3419_v39 = vcombine.low %v5037_v57, %v4867_v21  ;;  %v4393_v9 = vld [vmem:[%s5627_s1 + $0x80] sm:$0xff]   ;;  %v4396_v20 = vld [vmem:[%s5627_s1 + $0xc8] sm:$0xff]  }
  0x55   : > { %4013 = vmatprep.subr.bf16.mxu1 %v4386_v54  ;;  %4041 = vmatprep.subr.bf16.mxu0 %v4392_v8  ;;  %v395_v33 = vsel %vm4837_vm0, 0, %v394_v27  ;;  %v1008_v36 = vor.u32 %v1007_v24, %v1003_v13  ;;  %v1098_v21 = vrot.slane %v3417_v29, 1  ;;  %v373_v54 = vld [vmem:[#allocation2 + $0x8] sm:$0x11]  ;;  %v3422_v2 = vcombine.high %v876_v62, %v4958_v44  ;;  %v5109_v29 = vld [vmem:[#allocation2 + $0x18] sm:$0x11] }
  0x56   : > { %v1022_v37 = vor.u32 %v1021_v25, %v1017_v15  ;;  %396 = vst [vmem:[#allocation2 + $0x78] sm:$0x11] %v395_v33  ;;  %v3544_v43 = vcombine.low %v1015_v31, %v1029_v32  ;;  %v865_v46 = vld [vmem:[#allocation2 + $0x80] sm:$0xff]  ;;  %v1100_v52 = vrot.slane %v3419_v39, 1  ;;  %v374_v57 = vsel %vm4837_vm0, 0, %v373_v54  ;;  %434 = vst [vmem:[#allocation2] sm:$0xff] %v433_v19 }
  0x57   : > { %375 = vst [vmem:[#allocation2 + $0x8] sm:$0x11] %v374_v57  ;;  %v3424_v3 = vcombine.high %v877_v63, %v4979_v60  ;;  %v1103_v10 = vrot.slane %v3422_v2, 1  ;;  %v3421_v12 = vcombine.low %v876_v62, %v4958_v44  ;;  %v3423_v32 = vcombine.low %v877_v63, %v4979_v60  ;;  %v4397_v60 = vld [vmem:[%s5627_s1 + $0x88] sm:$0xff]   ;;  %v4406_v54 = vld [vmem:[%s5627_s1 + $0x90] sm:$0xff]   ;;  %v4409_v62 = vld [vmem:[%s5627_s1 + $0xd8] sm:$0xff]  }
  0x58   : > { %4014 = vmatpush3.bf16.msra.mxu1 %v4391_v4  ;;  %v3543_v48 = vcombine.low %v1008_v36, %v1022_v37  ;;  %1692 = vmatprep.mubr.bf16.mxu1 %v3544_v43  ;;  %v5092_v1 = vld [vmem:[#allocation2 + $0x88] sm:$0x11]  ;;  %v3533_v8 = vcombine.low %v1098_v21, %v1100_v52  ;;  %v5125_v52 = vcombine.low %v4861_v17, %v5109_v29  ;;  %v879_v57 = vld [vmem:[#allocation2 + $0x60] sm:$0xee] }
  0x59   : > { %4015 = vmatprep.subr.bf16.mxu1 %v4394_v35  ;;  %v5079_v45 = vld [vmem:[#allocation2 + $0x70] sm:$0xff]  ;;  %v3416_v5 = vcombine.high %v865_v46, %v5092_v1  ;;  %v3415_v7 = vcombine.low %v865_v46, %v5092_v1  ;;  %v1105_v11 = vrot.slane %v3424_v3, 1  ;;  %v1102_v36 = vrot.slane %v3421_v12, 1 }
  0x5a   : > { %v3548_v49 = vcombine.high %v5079_v45, %v865_v46  ;;  %v3547_v50 = vcombine.low %v5079_v45, %v865_v46  ;;  %1693 = vmatmul.mubr.bf16.gmra.mrb[8].mxu1 %v3543_v48  ;;  %v1104_v48 = vrot.slane %v3423_v32, 1  ;;  %v3426_v63 = vcombine.high %v878_v56, %v5039_v58  ;;  %v4421_v32 = vld [vmem:[%s5627_s1 + $0xe8] sm:$0xff]  }
  0x5b   : > { %v1052_v15 = vshrl.u32 %v3416_v5, 16  ;;  %v1054_v16 = vshll.u32 %v3416_v5, 16  ;;  %v1045_v24 = vshrl.u32 %v3415_v7, 16  ;;  %v1047_v25 = vshll.u32 %v3415_v7, 16 }
  0x5c   : > { %4016 = vmatpush3.bf16.msra.mxu1 %v4395_v42  ;;  %1635 = vmatprep.mubr.bf16.mxu0 %v3548_v49  ;;  %v3540_v31 = vcombine.low %v1103_v10, %v1105_v11  ;;  %v3539_v53 = vcombine.low %v1102_v36, %v1104_v48  ;;  %v3428_v2 = vcombine.high %v879_v57, %v5041_v59  ;;  %v579_v5 = vshll.u32 %v5125_v52, 16  ;;  %v4411_v36 = vld [vmem:[%s5627_s1 + $0x150] sm:$0xff]  }
  0x5d   : > { %1636 = vmatmul.mubr.bf16.gmra.mrb[12].mxu0 %v3547_v50  ;;  %v5090_v0 = vld [vmem:[#allocation2 + $0x78] sm:$0x11]  ;;  %4081 = vmatprep.subr.bf16.mxu1 %v4399_v61  ;;  %v1056_v28 = vrot.slane %v1054_v16, 1  ;;  %v1049_v33 = vrot.slane %v1047_v25, 1  ;;  %v3602_v50 = vcombine.high %v433_v19, %v4861_v17  ;;  %v5132_v61 = vcombine.high %v4861_v17, %v5109_v29 }
  0x5e   : > { %1741 = vmatprep.mubr.bf16.mxu0 %v3534_v51  ;;  %v3414_v4 = vcombine.high %v5079_v45, %v5090_v0  ;;  %v3413_v6 = vcombine.low %v5079_v45, %v5090_v0  ;;  %v435_v35 = vld [vmem:[#allocation2 + $0x8] sm:$0x11]  ;;  %v4405_v51 = vld [vmem:[%s5627_s1 + $0xd0] sm:$0xff]   ;;  %v3425_v3 = vcombine.low %v878_v56, %v5039_v58  ;;  %v1107_v10 = vrot.slane %v3426_v63, 1  ;;  %v4420_v56 = vld [vmem:[%s5627_s1 + $0x118] sm:$0xff]  }
  0x5f   : > { %v1057_v39 = vor.u32 %v1056_v28, %v1052_v15  ;;  %v436_v42 = vsel %vm4812_vm13, 0, %v435_v35  ;;  %v1050_v46 = vor.u32 %v1049_v33, %v1045_v24  ;;  %v1109_v11 = vrot.slane %v3428_v2, 1  ;;  %v4408_v24 = vld [vmem:[%s5627_s1 + $0x108] sm:$0xff]   ;;  %v4418_v28 = vld [vmem:[%s5627_s1 + $0xa0] sm:$0xff]   ;;  %v4430_v2 = vld [vmem:[%s5627_s1 + $0xb0] sm:$0xff]  }
  0x60   : > { %v1038_v13 = vshrl.u32 %v3414_v4, 16  ;;  %v1040_v14 = vshll.u32 %v3414_v4, 16  ;;  %v1031_v22 = vshrl.u32 %v3413_v6, 16  ;;  %v1033_v23 = vshll.u32 %v3413_v6, 16  ;;  %437 = vst [vmem:[#allocation2 + $0x8] sm:$0x11] %v436_v42 }
  0x61   : > { %v577_v4 = vshrl.u32 %v5125_v52, 16  ;;  %v3427_v6 = vcombine.low %v879_v57, %v5041_v59  ;;  %v1106_v58 = vrot.slane %v3425_v3, 1  ;;  %v3608_v15 = vcombine.high %v4863_v18, %v4927_v26  ;;  %v881_v33 = vld [vmem:[#allocation2 + $0x80] sm:$0xee]  ;;  %v4433_v3 = vld [vmem:[%s5627_s1 + $0xf8] sm:$0xff]   ;;  %v4432_v52 = vld [vmem:[%s5627_s1 + $0x128] sm:$0xff]  }
  0x62   : > { %v1042_v27 = vrot.slane %v1040_v14, 1  ;;  %v1035_v44 = vrot.slane %v1033_v23, 1  ;;  %v586_v14 = vshll.u32 %v5132_v61, 16  ;;  %v3546_v16 = vcombine.low %v1107_v10, %v1109_v11  ;;  %v4407_v23 = vld [vmem:[%s5627_s1 + $0x148] sm:$0xff]  }
  0x63   : > { %v1108_v59 = vrot.slane %v3427_v6, 1  ;;  %v3607_v48 = vcombine.low %v4863_v18, %v4927_v26  ;;  %v4423_v6 = vld [vmem:[%s5627_s1 + $0x160] sm:$0xff]  }
  0x64   : > { %v1043_v37 = vor.u32 %v1042_v27, %v1038_v13  ;;  %v1036_v43 = vor.u32 %v1035_v44, %v1031_v22  ;;  %v3601_v13 = vcombine.low %v433_v19, %v4861_v17  ;;  %v5159_v22 = vrot.slane %v579_v5, 1  ;;  %v4417_v17 = vld [vmem:[%s5627_s1 + $0xe0] sm:$0xff]   ;;  %v880_v44 = vld [vmem:[#allocation2 + $0x70] sm:$0xee] }
  0x65   : > { %1742 = vmatmul.mubr.bf16.vlgmr.msra.gmra.mrb[16].mxu0 %v3533_v8  ;;  %v4402_v8 = vld [vmem:[%s5627_s1 + $0x100] sm:$0xff]   ;;  %v3545_v25 = vcombine.low %v1106_v58, %v1108_v59  ;;  %v588_v34 = vrot.slane %v586_v14, 1  ;;  %v3613_v58 = vcombine.low %v4934_v30, %v5014_v38  ;;  %v3620_v59 = vcombine.high %v5019_v41, %v5079_v45 }
  0x66   : > { %4042 = vmatpush3.bf16.msra.mxu0 %v4393_v9  ;;  %1749 = vmatprep.mubr.bf16.mxu0 %v3540_v31  ;;  %v3550_v49 = vcombine.low %v1043_v37, %v1057_v39  ;;  %v3549_v21 = vcombine.low %v1036_v43, %v1050_v46  ;;  %v4410_v9 = vld [vmem:[%s5627_s1 + $0x98] sm:$0xff]   ;;  %v584_v31 = vshrl.u32 %v5132_v61, 16  ;;  %v3430_v37 = vcombine.high %v880_v44, %v5090_v0  ;;  %v4414_v43 = vld [vmem:[%s5627_s1 + $0x110] sm:$0xff]   ;;  %v4439_v14 = vld [vmem:[%s5627_s1 + $0x300] sm:$0xff]  }
  0x67   : > { %4043 = vmatprep.subr.bf16.mxu0 %v4396_v20  ;;  %v5143_v7 = vld [vmem:[#allocation2 + $0x8] sm:$0x11]  ;;  %v3432_v39 = vcombine.high %v881_v33, %v5092_v1  ;;  %v3431_v46 = vcombine.low %v881_v33, %v5092_v1  ;;  %v3614_v1 = vcombine.high %v4934_v30, %v5014_v38  ;;  %v4429_v61 = vld [vmem:[%s5627_s1 + $0xf0] sm:$0xff]   ;;  %v582_v11 = vor.u32 %v5159_v22, %v577_v4  ;;  %v4438_v30 = vld [vmem:[%s5627_s1 + $0x340] sm:$0xff]  }
  0x68   : > { %1700 = vmatprep.mubr.bf16.mxu1 %v3550_v49  ;;  %v5152_v12 = vcombine.low %v433_v19, %v5143_v7  ;;  %v3370_v27 = vcombine.high %v433_v19, %v5143_v7  ;;  %v3429_v19 = vcombine.low %v880_v44, %v5090_v0  ;;  %v4419_v49 = vld [vmem:[%s5627_s1 + $0x158] sm:$0xff]   ;;  %v4422_v0 = vld [vmem:[%s5627_s1 + $0xa8] sm:$0xff]   ;;  %v589_v63 = vor.u32 %v588_v34, %v584_v31  ;;  %v4435_v22 = vld [vmem:[%s5627_s1 + $0x170] sm:$0xff]  }
  0x69   : > { %1701 = vmatmul.mubr.bf16.gmra.mrb[12].mxu1 %v3549_v21  ;;  %v5254_v31 = vld [vmem:[#allocation2 + $0x28] sm:$0x11] }
  0x6a   : > { %4044 = vmatpush3.bf16.msra.mxu0 %v4397_v60  ;;  %2142 = vmatprep.mubr.bf16.mxu1 %v3602_v50  ;;  %v565_v20 = vshll.u32 %v5152_v12, 16  ;;  %v563_v35 = vshrl.u32 %v5152_v12, 16  ;;  %v572_v60 = vshll.u32 %v3370_v27, 16  ;;  %v1111_v50 = vrot.slane %v3430_v37, 1  ;;  %v4434_v12 = vld [vmem:[%s5627_s1 + $0xb8] sm:$0xff]  }
  0x6b   : > { %4045 = vmatprep.subr.bf16.mxu0 %v4405_v51  ;;  %v1113_v51 = vrot.slane %v3432_v39, 1  ;;  %v1110_v21 = vrot.slane %v3429_v19, 1 }
  0x6c   : > { %v567_v42 = vrot.slane %v565_v20, 1  ;;  %v491_v20 = vld [vmem:[#allocation2 + $0x10] sm:$0xee] }
  0x6d   : > { %1750 = vmatmul.mubr.bf16.gmra.mrb[20].mxu0 %v3539_v53  ;;  %v1112_v53 = vrot.slane %v3431_v46, 1  ;;  %v3552_v18 = vcombine.low %v1111_v50, %v1113_v51  ;;  %v4453_v50 = vld [vmem:[%s5627_s1 + $0x310] sm:$0xff]  }
  0x6e   : > { %4046 = vmatpush3.bf16.msra.mxu0 %v4406_v54  ;;  %1757 = vmatprep.mubr.bf16.mxu0 %v3546_v16  ;;  %v570_v54 = vshrl.u32 %v3370_v27, 16  ;;  %v568_v10 = vor.u32 %v567_v42, %v563_v35  ;;  %v490_v16 = vld [vmem:[#allocation2] sm:$0xee]  ;;  %v4437_v27 = vld [vmem:[%s5627_s1 + $0x130] sm:$0xff]  }
  0x6f   : > { %4047 = vmatprep.subr.bf16.mxu0 %v4409_v62  ;;  %v3551_v57 = vcombine.low %v1110_v21, %v1112_v53  ;;  %v574_v62 = vrot.slane %v572_v60, 1  ;;  %v4542_v35 = vld [vmem:[#allocation2 + $0x20] sm:$0xff]  ;;  %v4452_v42 = vld [vmem:[%s5627_s1 + $0x350] sm:$0xff]   ;;  %v4441_v53 = vld [vmem:[%s5627_s1 + $0x138] sm:$0xff]  }
  0x70   : > { %v3603_v4 = vcombine.low %v568_v10, %v582_v11  ;;  %v3373_v39 = vcombine.low %v4542_v35, %v5254_v31  ;;  %v493_v10 = vld [vmem:[#allocation2 + $0x30] sm:$0xee] }
  0x71   : > { %2143 = vmatmul.mubr.bf16.vlgmr.msra.gmra.mrb[16].mxu1 %v3601_v13  ;;  %v575_v5 = vor.u32 %v574_v62, %v570_v54  ;;  %v4431_v13 = vld [vmem:[%s5627_s1 + $0x168] sm:$0xff]   ;;  %v4456_v62 = vld [vmem:[%s5627_s1 + $0x358] sm:$0xff]  }
  0x72   : > { %4048 = vmatpush3.bf16.msra.mxu0 %v4410_v9  ;;  %4082 = vmatpush3.bf16.msra.mxu1 %v4402_v8  ;;  %v4426_v8 = vld [vmem:[%s5627_s1 + $0x120] sm:$0xff]   ;;  %v593_v21 = vshll.u32 %v3373_v39, 16 }
  0x73   : > { %2150 = vmatprep.mubr.bf16.mxu1 %v3608_v15  ;;  %4083 = vmatprep.subr.bf16.mxu1 %v4407_v23  ;;  %v3604_v9 = vcombine.low %v575_v5, %v589_v63  ;;  %v4442_v15 = vld [vmem:[%s5627_s1 + $0x348] sm:$0xff]   ;;  %v3385_v23 = vcombine.low %v490_v16, %v5143_v7 }
  0x74   : > { %4049 = vmatprep.subr.bf16.mxu0 %v4417_v17  ;;  %v3386_v17 = vcombine.high %v490_v16, %v5143_v7  ;;  %v4440_v7 = vld [vmem:[%s5627_s1 + $0x178] sm:$0xff]  }
  0x75   : > { %1758 = vmatmul.mubr.bf16.gmra.mrb[24].mxu0 %v3545_v25  ;;  %v3619_v25 = vcombine.low %v5019_v41, %v5079_v45  ;;  %v4443_v41 = vld [vmem:[%s5627_s1 + $0x308] sm:$0xff]   ;;  %v5264_v44 = vrot.slane %v3385_v23, 1 }
  0x76   : > { %4050 = vmatpush3.bf16.msra.mxu0 %v4418_v28  ;;  %4084 = vmatpush3.bf16.msra.mxu1 %v4408_v24  ;;  %v3387_v24 = vcombine.low %v491_v20, %v5109_v29  ;;  %v3388_v28 = vcombine.high %v491_v20, %v5109_v29  ;;  %v715_v33 = vrot.slane %v3386_v17, 1  ;;  %v3374_v29 = vcombine.high %v4542_v35, %v5254_v31 }
  0x77   : > { %4051 = vmatprep.subr.bf16.mxu0 %v4421_v32  ;;  %4085 = vmatprep.subr.bf16.mxu1 %v4411_v36  ;;  %v5256_v32 = vld [vmem:[#allocation2 + $0x38] sm:$0x11] }
  0x78   : > { %1765 = vmatprep.mubr.bf16.mxu0 %v3552_v18  ;;  %v5266_v34 = vrot.slane %v3387_v24, 1  ;;  %v717_v36 = vrot.slane %v3388_v28, 1  ;;  %v3376_v37 = vcombine.high %v4927_v26, %v5256_v32  ;;  %v3375_v19 = vcombine.low %v4927_v26, %v5256_v32  ;;  %v4448_v18 = vld [vmem:[%s5627_s1 + $0x3c0] sm:$0xff]  }
  0x79   : > { %2151 = vmatmul.mubr.bf16.gmra.mrb[20].mxu1 %v3607_v48  ;;  %v600_v46 = vshll.u32 %v3374_v29, 16  ;;  %v4464_v24 = vld [vmem:[%s5627_s1 + $0x360] sm:$0xff]  }
  0x7a   : > { %4052 = vmatpush3.bf16.msra.mxu0 %v4422_v0  ;;  %4086 = vmatpush3.bf16.msra.mxu1 %v4414_v43  ;;  %v598_v43 = vshrl.u32 %v3374_v29, 16  ;;  %v3606_v60 = vcombine.low %v715_v33, %v717_v36  ;;  %v612_v48 = vshrl.u32 %v3376_v37, 16  ;;  %v591_v0 = vshrl.u32 %v3373_v39, 16  ;;  %v4465_v33 = vld [vmem:[%s5627_s1 + $0x320] sm:$0xff]  }
  0x7b   : > { %2158 = vmatprep.mubr.bf16.mxu1 %v3614_v1  ;;  %4087 = vmatprep.subr.bf16.mxu1 %v4419_v49  ;;  %v614_v49 = vshll.u32 %v3376_v37, 16  ;;  %v602_v51 = vrot.slane %v600_v46, 1  ;;  %v605_v26 = vshrl.u32 %v3375_v19, 16  ;;  %v607_v1 = vshll.u32 %v3375_v19, 16  ;;  %v4463_v37 = vld [vmem:[%s5627_s1 + $0x390] sm:$0xff]  }
  0x7c   : > { %4053 = vmatprep.subr.bf16.mxu0 %v4429_v61 }
  0x7d   : > { %1766 = vmatmul.mubr.bf16.gmra.mrb[28].mxu0 %v3551_v57  ;;  %v616_v54 = vrot.slane %v614_v49, 1  ;;  %v595_v57 = vrot.slane %v593_v21, 1  ;;  %v609_v61 = vrot.slane %v607_v1, 1  ;;  %v494_v1 = vld [vmem:[#allocation2 + $0x40] sm:$0xee] }
  0x7e   : > { %4054 = vmatpush3.bf16.msra.mxu0 %v4430_v2  ;;  %4088 = vmatpush3.bf16.msra.mxu1 %v4420_v56  ;;  %v603_v56 = vor.u32 %v602_v51, %v598_v43  ;;  %v4450_v2 = vld [vmem:[%s5627_s1 + $0x380] sm:$0xff]  }
  0x7f   : > { %4055 = vmatprep.subr.bf16.mxu0 %v4433_v3  ;;  %4089 = vmatprep.subr.bf16.mxu1 %v4423_v6  ;;  %v617_v63 = vor.u32 %v616_v54, %v612_v48  ;;  %v3605_v3 = vcombine.low %v5264_v44, %v5266_v34  ;;  %v596_v5 = vor.u32 %v595_v57, %v591_v0  ;;  %v4468_v0 = vld [vmem:[%s5627_s1 + $0x368] sm:$0xff]  }
  0x80   : > { %2207 = vmatprep.mubr.bf16.mxu0 %v3604_v9  ;;  %v610_v6 = vor.u32 %v609_v61, %v605_v26  ;;  %v492_v9 = vld [vmem:[#allocation2 + $0x20] sm:$0xee]  ;;  %v4469_v26 = vld [vmem:[%s5627_s1 + $0x328] sm:$0xff]  }
  0x81   : > { %2159 = vmatmul.mubr.bf16.gmra.mrb[24].mxu1 %v3613_v58  ;;  %v3610_v11 = vcombine.low %v603_v56, %v617_v63  ;;  %v4457_v58 = vld [vmem:[%s5627_s1 + $0x318] sm:$0xff]   ;;  %v5344_v63 = vld [vmem:[#allocation2 + $0x68] sm:$0x11] }
  0x82   : > { %4056 = vmatpush3.bf16.msra.mxu0 %v4434_v12  ;;  %4090 = vmatpush3.bf16.msra.mxu1 %v4426_v8  ;;  %v4454_v8 = vld [vmem:[%s5627_s1 + $0x3c8] sm:$0xff]   ;;  %v3390_v12 = vcombine.high %v492_v9, %v5254_v31 }
  0x83   : > { %2166 = vmatprep.mubr.bf16.mxu1 %v3620_v59  ;;  %4091 = vmatprep.subr.bf16.mxu1 %v4431_v13  ;;  %v3392_v13 = vcombine.high %v493_v10, %v5256_v32  ;;  %v3609_v59 = vcombine.low %v596_v5, %v610_v6 }
  0x84   : > { %4121 = vmatprep.subr.bf16.mxu0 %v4438_v30  ;;  %v5302_v30 = vld [vmem:[#allocation2 + $0x48] sm:$0x11]  ;;  %v719_v16 = vrot.slane %v3390_v12, 1 }
  0x85   : > { %2208 = vmatmul.mubr.bf16.vlgmr.msra.gmra.mrb[32].mxu0 %v3603_v4  ;;  %v3389_v4 = vcombine.low %v492_v9, %v5254_v31  ;;  %v721_v20 = vrot.slane %v3392_v13, 1  ;;  %v3394_v56 = vcombine.high %v494_v1, %v5302_v30  ;;  %v3393_v61 = vcombine.low %v494_v1, %v5302_v30  ;;  %v4544_v9 = vld [vmem:[#allocation2 + $0x60] sm:$0xff]  ;;  %v5388_v1 = vld [vmem:[#allocation2 + $0x38] sm:$0x11] }
  0x86   : > { %4122 = vmatpush3.bf16.msra.mxu0 %v4439_v14  ;;  %4092 = vmatpush3.bf16.msra.mxu1 %v4432_v52  ;;  %v5304_v52 = vld [vmem:[#allocation2 + $0x58] sm:$0x11]  ;;  %v3391_v14 = vcombine.low %v493_v10, %v5256_v32  ;;  %v3382_v10 = vcombine.high %v4544_v9, %v5344_v63 }
  0x87   : > { %4123 = vmatprep.subr.bf16.mxu0 %v4442_v15  ;;  %4093 = vmatprep.subr.bf16.mxu1 %v4435_v22  ;;  %v4455_v15 = vld [vmem:[%s5627_s1 + $0x388] sm:$0xff]   ;;  %v4543_v22 = vld [vmem:[#allocation2 + $0x40] sm:$0xff]  ;;  %v3380_v17 = vcombine.high %v5014_v38, %v5304_v52  ;;  %v3379_v31 = vcombine.low %v5014_v38, %v5304_v52  ;;  %v3612_v32 = vcombine.low %v719_v16, %v721_v20  ;;  %v723_v5 = vrot.slane %v3394_v56, 1  ;;  %v4477_v16 = vld [vmem:[%s5627_s1 + $0x330] sm:$0xff]  }
  0x88   : > { %2215 = vmatprep.mubr.bf16.mxu0 %v3610_v11  ;;  %v3378_v23 = vcombine.high %v4543_v22, %v5302_v30  ;;  %v3377_v28 = vcombine.low %v4543_v22, %v5302_v30  ;;  %v722_v12 = vrot.slane %v3393_v61, 1  ;;  %v4492_v61 = vld [vmem:[%s5627_s1 + $0x440] sm:$0xff]  }
  0x89   : > { %2167 = vmatmul.mubr.bf16.gmra.mrb[28].mxu1 %v3619_v25  ;;  %v718_v25 = vrot.slane %v3389_v4, 1  ;;  %v640_v34 = vshrl.u32 %v3380_v17, 16  ;;  %v642_v35 = vshll.u32 %v3380_v17, 16  ;;  %v633_v39 = vshrl.u32 %v3379_v31, 16 }
  0x8a   : > { %4124 = vmatpush3.bf16.msra.mxu0 %v4443_v41  ;;  %4094 = vmatpush3.bf16.msra.mxu1 %v4437_v27  ;;  %v720_v27 = vrot.slane %v3391_v14, 1  ;;  %v626_v41 = vshrl.u32 %v3378_v23, 16  ;;  %v628_v44 = vshll.u32 %v3378_v23, 16  ;;  %v619_v29 = vshrl.u32 %v3377_v28, 16  ;;  %v4475_v23 = vld [vmem:[%s5627_s1 + $0x3a0] sm:$0xff]  }
  0x8b   : > { %2272 = vmatprep.mubr.bf16.mxu1 %v3606_v60  ;;  %4095 = vmatprep.subr.bf16.mxu1 %v4440_v7  ;;  %v4460_v7 = vld [vmem:[%s5627_s1 + $0x3d0] sm:$0xff]   ;;  %v621_v36 = vshll.u32 %v3377_v28, 16  ;;  %v635_v19 = vshll.u32 %v3379_v31, 16  ;;  %v4466_v60 = vld [vmem:[%s5627_s1 + $0x3d8] sm:$0xff]   ;;  %v654_v4 = vshrl.u32 %v3382_v10, 16  ;;  %v656_v14 = vshll.u32 %v3382_v10, 16 }
  0x8c   : > { %4125 = vmatprep.subr.bf16.mxu0 %v4452_v42  ;;  %v630_v38 = vrot.slane %v628_v44, 1  ;;  %v644_v42 = vrot.slane %v642_v35, 1  ;;  %v3611_v43 = vcombine.low %v718_v25, %v720_v27  ;;  %v4478_v28 = vld [vmem:[%s5627_s1 + $0x3e8] sm:$0xff]   ;;  %v4493_v10 = vld [vmem:[%s5627_s1 + $0x400] sm:$0xff]  }
  0x8d   : > { %2216 = vmatmul.mubr.bf16.gmra.mrb[36].mxu0 %v3609_v59  ;;  %v623_v46 = vrot.slane %v621_v36, 1  ;;  %v637_v49 = vrot.slane %v635_v19, 1  ;;  %v3381_v59 = vcombine.low %v4544_v9, %v5344_v63  ;;  %v4481_v36 = vld [vmem:[%s5627_s1 + $0x338] sm:$0xff]  }
  0x8e   : > { %4126 = vmatpush3.bf16.msra.mxu0 %v4453_v50  ;;  %4096 = vmatpush3.bf16.msra.mxu1 %v4441_v53  ;;  %v631_v48 = vor.u32 %v630_v38, %v626_v41  ;;  %v645_v50 = vor.u32 %v644_v42, %v640_v34  ;;  %v495_v53 = vld [vmem:[#allocation2 + $0x50] sm:$0xee]  ;;  %v496_v38 = vld [vmem:[#allocation2 + $0x60] sm:$0xee] }
  0x8f   : > { %4127 = vmatprep.subr.bf16.mxu0 %v4456_v62  ;;  %4161 = vmatprep.subr.bf16.mxu1 %v4448_v18  ;;  %v624_v51 = vor.u32 %v623_v46, %v619_v29  ;;  %v638_v21 = vor.u32 %v637_v49, %v633_v39  ;;  %v4467_v18 = vld [vmem:[%s5627_s1 + $0x398] sm:$0xff]   ;;  %v3396_v57 = vcombine.high %v495_v53, %v5304_v52  ;;  %v647_v17 = vshrl.u32 %v3381_v59, 16  ;;  %v2306_v49 = vld [vmem:[#allocation2 + $0x20] sm:$0xff] }
  0x90   : > { %v3616_v54 = vcombine.low %v631_v48, %v645_v50  ;;  %v3398_v19 = vcombine.high %v496_v38, %v5344_v63  ;;  %v3397_v46 = vcombine.low %v496_v38, %v5344_v63  ;;  %v5386_v50 = vld [vmem:[#allocation2 + $0x28] sm:$0x11]  ;;  %v2311_v38 = vld [vmem:[#allocation2 + $0x70] sm:$0xff] }
  0x91   : > { %2273 = vmatmul.mubr.bf16.vlgmr.msra.gmra.mrb[32].mxu1 %v3605_v3  ;;  %v3615_v62 = vcombine.low %v624_v51, %v638_v21  ;;  %v3395_v3 = vcombine.low %v495_v53, %v5304_v52  ;;  %v725_v6 = vrot.slane %v3396_v57, 1  ;;  %v3673_v53 = vcombine.low %v2306_v49, %v5386_v50 }
  0x92   : > { %4162 = vmatpush3.bf16.msra.mxu1 %v4450_v2  ;;  %4128 = vmatpush3.bf16.msra.mxu0 %v4457_v58  ;;  %v5346_v2 = vld [vmem:[#allocation2 + $0x78] sm:$0x11]  ;;  %v4476_v58 = vld [vmem:[%s5627_s1 + $0x370] sm:$0xff]   ;;  %v727_v51 = vrot.slane %v3398_v19, 1 }
  0x93   : > { %4163 = vmatprep.subr.bf16.mxu1 %v4454_v8  ;;  %4129 = vmatprep.subr.bf16.mxu0 %v4464_v24  ;;  %v4472_v8 = vld [vmem:[%s5627_s1 + $0x3e0] sm:$0xff]   ;;  %v3384_v11 = vcombine.high %v5079_v45, %v5346_v2  ;;  %v724_v13 = vrot.slane %v3395_v3, 1  ;;  %v3383_v30 = vcombine.low %v5079_v45, %v5346_v2  ;;  %v3618_v52 = vcombine.low %v723_v5, %v725_v6 }
  0x94   : > { %2280 = vmatprep.mubr.bf16.mxu1 %v3612_v32  ;;  %2223 = vmatprep.mubr.bf16.mxu0 %v3616_v54  ;;  %v649_v24 = vshll.u32 %v3381_v59, 16  ;;  %v658_v45 = vrot.slane %v656_v14, 1  ;;  %v4490_v54 = vld [vmem:[%s5627_s1 + $0x3b0] sm:$0xff]   ;;  %v2395_v63 = vshrl.u32 %v3673_v53, 16  ;;  %v4495_v59 = vld [vmem:[%s5627_s1 + $0x3b8] sm:$0xff]  }
  0x95   : > { %2224 = vmatmul.mubr.bf16.gmra.mrb[40].mxu0 %v3615_v62  ;;  %v670_v20 = vshll.u32 %v3384_v11, 16  ;;  %v3617_v22 = vcombine.low %v722_v12, %v724_v13  ;;  %v661_v25 = vshrl.u32 %v3383_v30, 16  ;;  %v663_v27 = vshll.u32 %v3383_v30, 16  ;;  %v4494_v13 = vld [vmem:[%s5627_s1 + $0x3f8] sm:$0xff]  }
  0x96   : > { %4164 = vmatpush3.bf16.msra.mxu1 %v4455_v15  ;;  %4130 = vmatpush3.bf16.msra.mxu0 %v4465_v33  ;;  %v668_v15 = vshrl.u32 %v3384_v11, 16  ;;  %v651_v32 = vrot.slane %v649_v24, 1  ;;  %v659_v41 = vor.u32 %v658_v45, %v654_v4  ;;  %v4480_v33 = vld [vmem:[%s5627_s1 + $0x378] sm:$0xff]   ;;  %v4497_v45 = vld [vmem:[%s5627_s1 + $0x408] sm:$0xff]  }
  0x97   : > { %4165 = vmatprep.subr.bf16.mxu1 %v4460_v7  ;;  %4131 = vmatprep.subr.bf16.mxu0 %v4468_v0  ;;  %v672_v31 = vrot.slane %v670_v20, 1  ;;  %v4479_v7 = vld [vmem:[%s5627_s1 + $0x3a8] sm:$0xff]   ;;  %v665_v44 = vrot.slane %v663_v27, 1  ;;  %v2307_v0 = vld [vmem:[#allocation2 + $0x30] sm:$0xff] }
  0x98   : > { %v652_v35 = vor.u32 %v651_v32, %v647_v17  ;;  %v3675_v56 = vcombine.low %v2307_v0, %v5388_v1  ;;  %v3802_v57 = vcombine.high %v2306_v49, %v2307_v0  ;;  %v3676_v11 = vcombine.high %v2307_v0, %v5388_v1  ;;  %v2309_v20 = vld [vmem:[#allocation2 + $0x50] sm:$0xff] }
  0x99   : > { %2281 = vmatmul.mubr.bf16.gmra.mrb[36].mxu1 %v3611_v43  ;;  %v673_v34 = vor.u32 %v672_v31, %v668_v15  ;;  %v666_v29 = vor.u32 %v665_v44, %v661_v25  ;;  %v4484_v43 = vld [vmem:[%s5627_s1 + $0x3f0] sm:$0xff]   ;;  %v3801_v12 = vcombine.low %v2306_v49, %v2307_v0  ;;  %v5423_v44 = vld [vmem:[#allocation2 + $0x48] sm:$0x11] }
  0x9a   : > { %4166 = vmatpush3.bf16.msra.mxu1 %v4463_v37  ;;  %4132 = vmatpush3.bf16.msra.mxu0 %v4469_v26  ;;  %v497_v37 = vld [vmem:[#allocation2 + $0x70] sm:$0xee]  ;;  %v726_v26 = vrot.slane %v3397_v46, 1  ;;  %v2409_v5 = vshrl.u32 %v3675_v56, 16  ;;  %v2411_v6 = vshll.u32 %v3675_v56, 16  ;;  %v2416_v14 = vshrl.u32 %v3676_v11, 16 }
  0x9b   : > { %4167 = vmatprep.subr.bf16.mxu1 %v4466_v60  ;;  %4133 = vmatprep.subr.bf16.mxu0 %v4476_v58  ;;  %v3622_v39 = vcombine.low %v659_v41, %v673_v34  ;;  %v3400_v42 = vcombine.high %v497_v37, %v5346_v2  ;;  %v3621_v60 = vcombine.low %v652_v35, %v666_v29  ;;  %v2418_v15 = vshll.u32 %v3676_v11, 16  ;;  %v5421_v32 = vld [vmem:[%s5627_s1 + $0x410] sm:$0xff]   ;;  %v5427_v34 = vld [vmem:[#allocation2 + $0x60] sm:$0xff] }
  0x9c   : > { %2288 = vmatprep.mubr.bf16.mxu1 %v3618_v52  ;;  %v3399_v48 = vcombine.low %v497_v37, %v5346_v2  ;;  %v2397_v2 = vshll.u32 %v3673_v53, 16  ;;  %v2413_v58 = vrot.slane %v2411_v6, 1  ;;  %v4496_v52 = vld [vmem:[%s5627_s1 + $0x448] sm:$0xff]   ;;  %v3814_v19 = vcombine.high %v5427_v34, %v2311_v38 }
  0x9d   : > { %2231 = vmatprep.mubr.bf16.mxu0 %v3622_v39  ;;  %v729_v21 = vrot.slane %v3400_v42, 1  ;;  %v2420_v25 = vrot.slane %v2418_v15, 1  ;;  %v5435_v39 = vld [vmem:[%s5627_s1 + $0x458] sm:$0xff]  }
  0x9e   : > { %4168 = vmatpush3.bf16.msra.mxu1 %v4467_v18  ;;  %4134 = vmatpush3.bf16.msra.mxu0 %v4477_v16  ;;  %v728_v18 = vrot.slane %v3399_v48, 1  ;;  %v2399_v9 = vrot.slane %v2397_v2, 1  ;;  %v2308_v16 = vld [vmem:[#allocation2 + $0x40] sm:$0xff]  ;;  %v2414_v24 = vor.u32 %v2413_v58, %v2409_v5  ;;  %v5450_v2 = vld [vmem:[#allocation2 + $0x68] sm:$0x11] }
  0x9f   : > { %4169 = vmatprep.subr.bf16.mxu1 %v4472_v8  ;;  %4135 = vmatprep.subr.bf16.mxu0 %v4480_v33  ;;  %v3624_v62 = vcombine.low %v727_v51, %v729_v21  ;;  %v3674_v8 = vcombine.high %v2306_v49, %v5386_v50  ;;  %v2421_v31 = vor.u32 %v2420_v25, %v2416_v14  ;;  %v5425_v33 = vld [vmem:[#allocation2 + $0x58] sm:$0x11]  ;;  %v367_v5 = vld [vmem:[#allocation2 + $0x90] sm:$0x11]  ;;  %v4513_v58 = vld [vmem:[%s5627_s1 + $0x420] sm:$0xff]  }
  0xa0   : > { %2232 = vmatmul.mubr.bf16.gmra.mrb[44].mxu0 %v3621_v60  ;;  %v3623_v3 = vcombine.low %v726_v26, %v728_v18  ;;  %v2400_v17 = vor.u32 %v2399_v9, %v2395_v63  ;;  %v3807_v41 = vcombine.low %v2308_v16, %v2309_v20  ;;  %v3678_v29 = vcombine.high %v2308_v16, %v5423_v44 }
  0xa1   : > { %2289 = vmatmul.mubr.bf16.gmra.mrb[40].mxu1 %v3617_v22  ;;  %3059 = vmatprep.mubr.bf16.mxu0 %v3802_v57  ;;  %v2402_v30 = vshrl.u32 %v3674_v8, 16  ;;  %v2404_v4 = vshll.u32 %v3674_v8, 16  ;;  %v3677_v37 = vcombine.low %v2308_v16, %v5423_v44  ;;  %v3679_v42 = vcombine.low %v2309_v20, %v5425_v33  ;;  %v4512_v57 = vld [vmem:[%s5627_s1 + $0x460] sm:$0xff]  }
  0xa2   : > { %4170 = vmatpush3.bf16.msra.mxu1 %v4475_v23  ;;  %4136 = vmatpush3.bf16.msra.mxu0 %v4481_v36  ;;  %v3808_v23 = vcombine.high %v2308_v16, %v2309_v20  ;;  %v3680_v36 = vcombine.high %v2309_v20, %v5425_v33  ;;  %v2430_v46 = vshrl.u32 %v3678_v29, 16  ;;  %v2432_v60 = vshll.u32 %v3678_v29, 16 }
  0xa3   : > { %4171 = vmatprep.subr.bf16.mxu1 %v4478_v28  ;;  %4201 = vmatprep.subr.bf16.mxu0 %v4492_v61  ;;  %v2406_v22 = vrot.slane %v2404_v4, 1  ;;  %v4502_v28 = vld [vmem:[%s5627_s1 + $0x450] sm:$0xff]   ;;  %v2423_v0 = vshrl.u32 %v3677_v37, 16  ;;  %v2425_v51 = vshll.u32 %v3677_v37, 16  ;;  %v2437_v21 = vshrl.u32 %v3679_v42, 16 }
  0xa4   : > { %2296 = vmatprep.mubr.bf16.mxu1 %v3624_v62  ;;  %v2444_v48 = vshrl.u32 %v3680_v36, 16  ;;  %v2446_v49 = vshll.u32 %v3680_v36, 16  ;;  %v2439_v26 = vshll.u32 %v3679_v42, 16  ;;  %v2434_v53 = vrot.slane %v2432_v60, 1  ;;  %v2323_v36 = vld [vmem:[#allocation2 + $0x30] sm:$0xee] }
  0xa5   : > { %v2407_v27 = vor.u32 %v2406_v22, %v2402_v30  ;;  %v2427_v18 = vrot.slane %v2425_v51, 1  ;;  %v3813_v63 = vcombine.low %v5427_v34, %v2311_v38  ;;  %v3682_v9 = vcombine.high %v5427_v34, %v5450_v2 }
  0xa6   : > { %4172 = vmatpush3.bf16.msra.mxu1 %v4479_v7  ;;  %v3803_v7 = vcombine.low %v2400_v17, %v2414_v24  ;;  %v2441_v56 = vrot.slane %v2439_v26, 1 }
  0xa7   : > { %4173 = vmatprep.subr.bf16.mxu1 %v4484_v43  ;;  %v3804_v35 = vcombine.low %v2407_v27, %v2421_v31  ;;  %v5442_v43 = vld [vmem:[%s5627_s1 + $0x418] sm:$0xff]   ;;  %v2428_v6 = vor.u32 %v2427_v18, %v2423_v0  ;;  %v2458_v4 = vshrl.u32 %v3682_v9, 16  ;;  %v2460_v14 = vshll.u32 %v3682_v9, 16 }
  0xa8   : > { %3060 = vmatmul.mubr.bf16.vlgmr.msra.gmra.mrb[48].mxu0 %v3801_v12  ;;  %v2442_v8 = vor.u32 %v2441_v56, %v2437_v21  ;;  %v368_v12 = vsel %vm4812_vm13, 0, %v367_v5 }
  0xa9   : > { %2297 = vmatmul.mubr.bf16.gmra.mrb[44].mxu1 %v3623_v3  ;;  %4202 = vmatpush3.bf16.msra.mxu0 %v4493_v10  ;;  %v5452_v3 = vld [vmem:[#allocation2 + $0x78] sm:$0x11]  ;;  %369 = vst [vmem:[#allocation2 + $0x90] sm:$0x11] %v368_v12  ;;  %v2462_v17 = vrot.slane %v2460_v14, 1 }
  0xaa   : > { %4174 = vmatpush3.bf16.msra.mxu1 %v4490_v54  ;;  %4203 = vmatprep.subr.bf16.mxu0 %v4496_v52  ;;  %v2448_v54 = vrot.slane %v2446_v49, 1  ;;  %v3809_v30 = vcombine.low %v2428_v6, %v2442_v8  ;;  %v3692_v49 = vcombine.high %v2323_v36, %v5388_v1 }
  0xab   : > { %4175 = vmatprep.subr.bf16.mxu1 %v4494_v13  ;;  %3067 = vmatprep.mubr.bf16.mxu0 %v3808_v23  ;;  %v3681_v13 = vcombine.low %v5427_v34, %v5450_v2  ;;  %v2463_v31 = vor.u32 %v2462_v17, %v2458_v4  ;;  %v2322_v34 = vld [vmem:[#allocation2 + $0x20] sm:$0xee] }
  0xac   : > { %3124 = vmatprep.mubr.bf16.mxu1 %v3804_v35  ;;  %v2449_v62 = vor.u32 %v2448_v54, %v2444_v48  ;;  %v3691_v48 = vcombine.low %v2323_v36, %v5388_v1  ;;  %v2549_v26 = vrot.slane %v3692_v49, 1  ;;  %v2324_v1 = vld [vmem:[#allocation2 + $0x40] sm:$0xee] }
  0xad   : > { %4204 = vmatpush3.bf16.msra.mxu0 %v4497_v45  ;;  %v2451_v20 = vshrl.u32 %v3681_v13, 16  ;;  %v2453_v22 = vshll.u32 %v3681_v13, 16  ;;  %v3694_v6 = vcombine.high %v2324_v1, %v5423_v44  ;;  %v3693_v9 = vcombine.low %v2324_v1, %v5423_v44  ;;  %v2328_v36 = vld [vmem:[#allocation2 + $0x80] sm:$0xee] }
  0xae   : > { %4176 = vmatpush3.bf16.msra.mxu1 %v4495_v59  ;;  %4205 = vmatprep.subr.bf16.mxu0 %v4502_v28  ;;  %v3683_v59 = vcombine.low %v2311_v38, %v5452_v3  ;;  %v2548_v56 = vrot.slane %v3691_v48, 1 }
  0xaf   : > { %4241 = vmatprep.subr.bf16.mxu1 %v4492_v61  ;;  %v2435_v61 = vor.u32 %v2434_v53, %v2430_v46  ;;  %v2455_v27 = vrot.slane %v2453_v22, 1  ;;  %v3689_v46 = vcombine.low %v2322_v34, %v5386_v50  ;;  %v2325_v53 = vld [vmem:[#allocation2 + $0x50] sm:$0xee]  ;;  %v2551_v47 = vrot.slane %v3694_v6, 1 }
  0xb0   : > { %3068 = vmatmul.mubr.bf16.gmra.mrb[52].mxu0 %v3807_v41  ;;  %v2465_v23 = vshrl.u32 %v3683_v59, 16  ;;  %v2467_v24 = vshll.u32 %v3683_v59, 16  ;;  %v4520_v41 = vld [vmem:[%s5627_s1 + $0x470] sm:$0xff]   ;;  %v3696_v8 = vcombine.high %v2325_v53, %v5425_v33  ;;  %v2550_v4 = vrot.slane %v3693_v9, 1 }
  0xb1   : > { %3125 = vmatmul.mubr.bf16.vlgmr.msra.gmra.mrb[48].mxu1 %v3803_v7  ;;  %4206 = vmatpush3.bf16.msra.mxu0 %v5421_v32  ;;  %v3810_v11 = vcombine.low %v2435_v61, %v2449_v62  ;;  %v2456_v29 = vor.u32 %v2455_v27, %v2451_v20  ;;  %v468_v42 = vld [vmem:[#allocation2 + $0x90] sm:$0xff]  ;;  %v2546_v18 = vrot.slane %v3689_v46, 1  ;;  %v4523_v61 = vld [vmem:[%s5627_s1 + $0x438] sm:$0xff]  }
  0xb2   : > { %4249 = vmatpush3.bf16.msra.mxu1 %v4493_v10  ;;  %4207 = vmatprep.subr.bf16.mxu0 %v5435_v39  ;;  %v3684_v10 = vcombine.high %v2311_v38, %v5452_v3  ;;  %v2469_v7 = vrot.slane %v2467_v24, 1  ;;  %v2312_v38 = vld [vmem:[#allocation2 + $0x80] sm:$0xff]  ;;  %v469_v55 = vsel %vm4803_vm10, 0, %v468_v42 }
  0xb3   : > { %4242 = vmatprep.subr.bf16.mxu1 %v4496_v52  ;;  %3075 = vmatprep.mubr.bf16.mxu0 %v3814_v19  ;;  %v4514_v52 = vld [vmem:[%s5627_s1 + $0x468] sm:$0xff]   ;;  %v3690_v19 = vcombine.high %v2322_v34, %v5386_v50  ;;  %470 = vst [vmem:[#allocation2 + $0x90] sm:$0xff] %v469_v55  ;;  %v3820_v0 = vcombine.high %v2312_v38, %v469_v55 }
  0xb4   : > { %v2472_v15 = vshrl.u32 %v3684_v10, 16  ;;  %3132 = vmatprep.mubr.bf16.mxu1 %v3810_v11  ;;  %v2474_v16 = vshll.u32 %v3684_v10, 16  ;;  %v2470_v37 = vor.u32 %v2469_v7, %v2465_v23  ;;  %v3819_v51 = vcombine.low %v2312_v38, %v469_v55  ;;  %v5492_v50 = vld [vmem:[#allocation2 + $0x88] sm:$0x11] }
  0xb5   : > { %4208 = vmatpush3.bf16.msra.mxu0 %v5442_v43  ;;  %v2547_v21 = vrot.slane %v3690_v19, 1  ;;  %v3685_v5 = vcombine.low %v2312_v38, %v5492_v50  ;;  %v3695_v10 = vcombine.low %v2325_v53, %v5425_v33  ;;  %v3805_v11 = vcombine.low %v2546_v18, %v2548_v56 }
  0xb6   : > { %4250 = vmatpush3.bf16.msra.mxu1 %v4497_v45  ;;  %4209 = vmatprep.subr.bf16.mxu0 %v4512_v57  ;;  %v4515_v45 = vld [vmem:[%s5627_s1 + $0x428] sm:$0xff]   ;;  %v2476_v25 = vrot.slane %v2474_v16, 1  ;;  %v3815_v60 = vcombine.low %v2456_v29, %v2470_v37  ;;  %v3702_v46 = vcombine.high %v2328_v36, %v5492_v50 }
  0xb7   : > { %4243 = vmatprep.subr.bf16.mxu1 %v4502_v28  ;;  %v400_v28 = vld [vmem:[#allocation2 + $0x98] sm:$0x11]  ;;  %v2481_v13 = vshll.u32 %v3685_v5, 16  ;;  %v2552_v14 = vrot.slane %v3695_v10, 1  ;;  %v2479_v20 = vshrl.u32 %v3685_v5, 16 }
  0xb8   : > { %3076 = vmatmul.mubr.bf16.gmra.mrb[56].mxu0 %v3813_v63  ;;  %v2477_v35 = vor.u32 %v2476_v25, %v2472_v15  ;;  %v3686_v63 = vcombine.high %v2312_v38, %v5492_v50 }
  0xb9   : > { %3133 = vmatmul.mubr.bf16.gmra.mrb[52].mxu1 %v3809_v30  ;;  %4210 = vmatpush3.bf16.msra.mxu0 %v4513_v58  ;;  %v2326_v30 = vld [vmem:[#allocation2 + $0x60] sm:$0xee]  ;;  %v2483_v33 = vrot.slane %v2481_v13, 1 }
  0xba   : > { %4251 = vmatpush3.bf16.msra.mxu1 %v5421_v32  ;;  %4211 = vmatprep.subr.bf16.mxu0 %v4514_v52  ;;  %v401_v32 = vsel %vm4837_vm0, 0, %v400_v28  ;;  %v2488_v12 = vshll.u32 %v3686_v63, 16  ;;  %v2486_v16 = vshrl.u32 %v3686_v63, 16  ;;  %v3698_v17 = vcombine.high %v2326_v30, %v5450_v2  ;;  %v2329_v38 = vld [vmem:[#allocation2 + $0x90] sm:$0xee] }
  0xbb   : > { %4244 = vmatprep.subr.bf16.mxu1 %v5435_v39  ;;  %402 = vst [vmem:[#allocation2 + $0x98] sm:$0x11] %v401_v32  ;;  %v3816_v39 = vcombine.low %v2463_v31, %v2477_v35  ;;  %3083 = vmatprep.mubr.bf16.mxu0 %v3820_v0 }
  0xbc   : > { %v2490_v44 = vrot.slane %v2488_v12, 1  ;;  %v2555_v35 = vrot.slane %v3698_v17, 1 }
  0xbd   : > { %4212 = vmatpush3.bf16.msra.mxu0 %v4515_v45  ;;  %3140 = vmatprep.mubr.bf16.mxu1 %v3816_v39  ;;  %v3697_v39 = vcombine.low %v2326_v30, %v5450_v2 }
  0xbe   : > { %4252 = vmatpush3.bf16.msra.mxu1 %v5442_v43  ;;  %4213 = vmatprep.subr.bf16.mxu0 %v4520_v41  ;;  %v4521_v43 = vld [vmem:[%s5627_s1 + $0x430] sm:$0xff]   ;;  %v2491_v7 = vor.u32 %v2490_v44, %v2486_v16 }
  0xbf   : > { %4245 = vmatprep.subr.bf16.mxu1 %v4512_v57  ;;  %v3806_v57 = vcombine.low %v2547_v21, %v2549_v26  ;;  %v2554_v0 = vrot.slane %v3697_v39, 1  ;;  %v3701_v26 = vcombine.low %v2328_v36, %v5492_v50 }
  0xc0   : > { %3084 = vmatmul.mubr.bf16.gmra.mrb[60].mxu0 %v3819_v51 }
  0xc1   : > { %3141 = vmatmul.mubr.bf16.gmra.mrb[56].mxu1 %v3815_v60  ;;  %4214 = vmatpush3.bf16.msra.mxu0 %v4521_v43 }
  0xc2   : > { %4253 = vmatpush3.bf16.msra.mxu1 %v4513_v58  ;;  %v471_v54 = vld [vmem:[#allocation2 + $0x98] sm:$0x11]  ;;  %4215 = vmatprep.subr.bf16.mxu0 %v4522_v40  ;;  %v2553_v58 = vrot.slane %v3696_v8, 1 }
  0xc3   : > { %4246 = vmatprep.subr.bf16.mxu1 %v4514_v52  ;;  %v472_v62 = vsel %vm4812_vm13, 0, %v471_v54  ;;  %3189 = vmatprep.mubr.bf16.mxu0 %v3806_v57  ;;  %v2327_v52 = vld [vmem:[#allocation2 + $0x70] sm:$0xee] }
  0xc4   : > { %473 = vst [vmem:[#allocation2 + $0x98] sm:$0x11] %v472_v62  ;;  %v3812_v59 = vcombine.low %v2551_v47, %v2553_v58  ;;  %v3700_v24 = vcombine.high %v2327_v52, %v5452_v3  ;;  %v3699_v42 = vcombine.low %v2327_v52, %v5452_v3  ;;  %v2558_v3 = vrot.slane %v3701_v26, 1 }
  0xc5   : > { %4216 = vmatpush3.bf16.msra.mxu0 %v4523_v61 }
  0xc6   : > { %4254 = vmatpush3.bf16.msra.mxu1 %v4515_v45  ;;  %v3811_v45 = vcombine.low %v2550_v4, %v2552_v14  ;;  %v2557_v29 = vrot.slane %v3700_v24, 1  ;;  %v2556_v51 = vrot.slane %v3699_v42, 1 }
  0xc7   : > { %4247 = vmatprep.subr.bf16.mxu1 %v4520_v41  ;;  %v2484_v41 = vor.u32 %v2483_v33, %v2479_v20 }
  0xc8   : > { %3190 = vmatmul.mubr.bf16.vlgmr.msra.gmra.mrb[64].mxu0 %v3805_v11  ;;  %v3818_v48 = vcombine.low %v2555_v35, %v2557_v29  ;;  %v3817_v21 = vcombine.low %v2554_v0, %v2556_v51 }
  0xc9   : > { %3197 = vmatprep.mubr.bf16.mxu0 %v3812_v59 }
  0xca   : > { %4255 = vmatpush3.bf16.msra.mxu1 %v4521_v43  ;;  %v2559_v43 = vrot.slane %v3702_v46, 1 }
  0xcb   : > { %4248 = vmatprep.subr.bf16.mxu1 %v4522_v40  ;;  %v2321_v15 = vld [vmem:[#allocation2 + $0x98] sm:$0x11] }
  0xcc   : > { %v3688_v22 = vcombine.high %v469_v55, %v2321_v15  ;;  %v3687_v23 = vcombine.low %v469_v55, %v2321_v15  ;;  %v3704_v49 = vcombine.high %v2329_v38, %v2321_v15  ;;  %v3703_v1 = vcombine.low %v2329_v38, %v2321_v15 }
  0xce   : > { %4256 = vmatpush3.bf16.msra.mxu1 %v4523_v61  ;;  %v2500_v25 = vshrl.u32 %v3688_v22, 16  ;;  %v2502_v27 = vshll.u32 %v3688_v22, 16  ;;  %v2493_v28 = vshrl.u32 %v3687_v23, 16  ;;  %v2495_v31 = vshll.u32 %v3687_v23, 16 }
  0xcf   : > { %v2561_v40 = vrot.slane %v3704_v49, 1  ;;  %v2560_v53 = vrot.slane %v3703_v1, 1 }
  0xd0   : > { %v2504_v32 = vrot.slane %v2502_v27, 1  ;;  %v2497_v34 = vrot.slane %v2495_v31, 1  ;;  %3198 = vmatmul.mubr.bf16.gmra.mrb[68].mxu0 %v3811_v45 }
  0xd1   : > { %v3824_v2 = vcombine.low %v2559_v43, %v2561_v40  ;;  %v3823_v54 = vcombine.low %v2558_v3, %v2560_v53 }
  0xd2   : > { %v2505_v37 = vor.u32 %v2504_v32, %v2500_v25  ;;  %v2498_v19 = vor.u32 %v2497_v34, %v2493_v28 }
  0xd4   : > { %v3822_v55 = vcombine.low %v2491_v7, %v2505_v37  ;;  %v3821_v60 = vcombine.low %v2484_v41, %v2498_v19 }
  0xd6   : > { %3148 = vmatprep.mubr.bf16.mxu1 %v3822_v55 }
  0xd7   : > { %3149 = vmatmul.mubr.bf16.gmra.mrb[60].mxu1 %v3821_v60 }
  0xd8   : > { %3205 = vmatprep.mubr.bf16.mxu1 %v3818_v48 }
  0xdf   : > { %3206 = vmatmul.mubr.bf16.vlgmr.msra.gmra.mrb[64].mxu1 %v3817_v21 }
  0xe0   : > { %3213 = vmatprep.mubr.bf16.mxu1 %v3824_v2 }
  0xe7   : > { %3214 = vmatmul.mubr.bf16.gmra.mrb[68].mxu1 %v3823_v54 }
 0x10a   : > { %v3897_v18 = vpop.f32.mrb[0].mxu0 }
 0x10b   : > { %v3898_v56 = vpop.f32.mrb[1].mxu0 }
 0x10c   : > { %v3899_v57 = vadd.f32 %v3898_v56, %v3897_v18  ;;  %v3900_v61 = vpop.f32.mrb[2].mxu0 }
 0x10d   : > { %v3901_v62 = vpop.f32.mrb[3].mxu0 }
 0x10e   : > { %v3902_v63 = vadd.f32 %v3901_v62, %v3900_v61 }
 0x112   : > { %v3937_v5 = vpop.f32.mrb[0].mxu1  ;;  %v3903_v58 = vpop.f32.mrb[4].mxu0 }
 0x113   : > { %v3938_v6 = vpop.f32.mrb[1].mxu1  ;;  %v3904_v12 = vpop.f32.mrb[5].mxu0 }
 0x114   : > { %v3939_v8 = vadd.f32 %v3938_v6, %v3937_v5  ;;  %v3940_v9 = vpop.f32.mrb[2].mxu1  ;;  %v3905_v13 = vadd.f32 %v3904_v12, %v3903_v58  ;;  %v3906_v59 = vpop.f32.mrb[6].mxu0 }
 0x115   : > { %v3941_v10 = vpop.f32.mrb[3].mxu1  ;;  %v3907_v30 = vpop.f32.mrb[7].mxu0 }
 0x116   : > { %v1679_v50 = vadd.f32 %v3939_v8, %v3899_v57  ;;  %v3942_v11 = vadd.f32 %v3941_v10, %v3940_v9  ;;  %v3908_v52 = vadd.f32 %v3907_v30, %v3906_v59 }
 0x118   : > { %v1682_v47 = vadd.f32 %v3942_v11, %v3902_v63 }
 0x122   : > { %v3943_v4 = vpop.f32.mrb[4].mxu1  ;;  %v3909_v14 = vpop.f32.mrb[8].mxu0 }
 0x123   : > { %v3944_v15 = vpop.f32.mrb[5].mxu1  ;;  %v3910_v16 = vpop.f32.mrb[9].mxu0 }
 0x124   : > { %v3945_v44 = vadd.f32 %v3944_v15, %v3943_v4  ;;  %v3946_v20 = vpop.f32.mrb[6].mxu1  ;;  %v3911_v33 = vadd.f32 %v3910_v16, %v3909_v14  ;;  %v3912_v22 = vpop.f32.mrb[10].mxu0 }
 0x125   : > { %v3947_v23 = vpop.f32.mrb[7].mxu1  ;;  %v3913_v17 = vpop.f32.mrb[11].mxu0 }
 0x126   : > { %v1687_v24 = vadd.f32 %v3945_v44, %v3905_v13  ;;  %v3948_v45 = vadd.f32 %v3947_v23, %v3946_v20  ;;  %v3914_v25 = vadd.f32 %v3913_v17, %v3912_v22 }
 0x128   : > { %v1690_v27 = vadd.f32 %v3948_v45, %v3908_v52 }
 0x12d   : > { %v3949_v28 = vpop.f32.mrb[8].mxu1 }
 0x12e   : > { %v3950_v31 = vpop.f32.mrb[9].mxu1 }
 0x12f   : > { %v3951_v7 = vadd.f32 %v3950_v31, %v3949_v28  ;;  %v3952_v41 = vpop.f32.mrb[10].mxu1 }
 0x130   : > { %v3915_v32 = vpop.f32.mrb[12].mxu0  ;;  %v3953_v34 = vpop.f32.mrb[11].mxu1 }
 0x131   : > { %v3916_v35 = vpop.f32.mrb[13].mxu0  ;;  %v1695_v29 = vadd.f32 %v3951_v7, %v3911_v33  ;;  %v3954_v36 = vadd.f32 %v3953_v34, %v3952_v41 }
 0x132   : > { %v3917_v38 = vadd.f32 %v3916_v35, %v3915_v32  ;;  %v3918_v37 = vpop.f32.mrb[14].mxu0 }
 0x133   : > { %v3919_v19 = vpop.f32.mrb[15].mxu0  ;;  %v1698_v39 = vadd.f32 %v3954_v36, %v3914_v25 }
 0x134   : > { %v3920_v42 = vadd.f32 %v3919_v19, %v3918_v37 }
 0x138   : > { %v3977_v46 = vpop.f32.mrb[16].mxu0 }
 0x139   : > { %v3978_v55 = vpop.f32.mrb[17].mxu0 }
 0x13a   : > { %v3979_v60 = vadd.f32 %v3978_v55, %v3977_v46  ;;  %v3980_v48 = vpop.f32.mrb[18].mxu0 }
 0x13b   : > { %v3981_v49 = vpop.f32.mrb[19].mxu0 }
 0x13c   : > { %v1744_v0 = vadd.f32 %v3979_v60, %v1679_v50  ;;  %v3982_v51 = vadd.f32 %v3981_v49, %v3980_v48  ;;  %v3955_v43 = vpop.f32.mrb[12].mxu1 }
 0x13d   : > { %v3956_v40 = vpop.f32.mrb[13].mxu1 }
 0x13e   : > { %v1747_v21 = vadd.f32 %v3982_v51, %v1682_v47  ;;  %v3957_v26 = vadd.f32 %v3956_v40, %v3955_v43  ;;  %v3958_v1 = vpop.f32.mrb[14].mxu1 }
 0x13f   : > { %v3959_v2 = vpop.f32.mrb[15].mxu1 }
 0x140   : > { %v3983_v3 = vpop.f32.mrb[20].mxu0  ;;  %v1703_v53 = vadd.f32 %v3957_v26, %v3917_v38  ;;  %v3960_v54 = vadd.f32 %v3959_v2, %v3958_v1 }
 0x141   : > { %v3984_v18 = vpop.f32.mrb[21].mxu0 }
 0x142   : > { %v3985_v56 = vadd.f32 %v3984_v18, %v3983_v3  ;;  %v3986_v57 = vpop.f32.mrb[22].mxu0  ;;  %v1706_v61 = vadd.f32 %v3960_v54, %v3920_v42 }
 0x143   : > { %v3987_v62 = vpop.f32.mrb[23].mxu0 }
 0x144   : > { %v1752_v63 = vadd.f32 %v3985_v56, %v1687_v24  ;;  %v3988_v5 = vadd.f32 %v3987_v62, %v3986_v57  ;;  %v4017_v6 = vpop.f32.mrb[16].mxu1 }
 0x145   : > { %v4018_v8 = vpop.f32.mrb[17].mxu1 }
 0x146   : > { %v1755_v9 = vadd.f32 %v3988_v5, %v1690_v27  ;;  %v4019_v10 = vadd.f32 %v4018_v8, %v4017_v6  ;;  %v4020_v50 = vpop.f32.mrb[18].mxu1 }
 0x147   : > { %v4021_v11 = vpop.f32.mrb[19].mxu1 }
 0x148   : > { %v3989_v47 = vpop.f32.mrb[24].mxu0  ;;  %v2145_v58 = vadd.f32 %v4019_v10, %v1744_v0  ;;  %v4022_v12 = vadd.f32 %v4021_v11, %v4020_v50 }
 0x149   : > { %v3990_v13 = vpop.f32.mrb[25].mxu0 }
 0x14a   : > { %v3991_v59 = vadd.f32 %v3990_v13, %v3989_v47  ;;  %v3992_v30 = vpop.f32.mrb[26].mxu0  ;;  %v2148_v52 = vadd.f32 %v4022_v12, %v1747_v21 }
 0x14b   : > { %v3993_v4 = vpop.f32.mrb[27].mxu0 }
 0x14c   : > { %v1760_v14 = vadd.f32 %v3991_v59, %v1695_v29  ;;  %v3994_v15 = vadd.f32 %v3993_v4, %v3992_v30  ;;  %v4023_v16 = vpop.f32.mrb[20].mxu1 }
 0x14d   : > { %v4024_v44 = vpop.f32.mrb[21].mxu1 }
 0x14e   : > { %v1763_v20 = vadd.f32 %v3994_v15, %v1698_v39  ;;  %v4025_v33 = vadd.f32 %v4024_v44, %v4023_v16  ;;  %v4026_v22 = vpop.f32.mrb[22].mxu1 }
 0x14f   : > { %v4027_v23 = vpop.f32.mrb[23].mxu1 }
 0x150   : > { %v3995_v17 = vpop.f32.mrb[28].mxu0  ;;  %v2153_v24 = vadd.f32 %v4025_v33, %v1752_v63  ;;  %v4028_v45 = vadd.f32 %v4027_v23, %v4026_v22 }
 0x151   : > { %v3996_v25 = vpop.f32.mrb[29].mxu0 }
 0x152   : > { %v3997_v27 = vadd.f32 %v3996_v25, %v3995_v17  ;;  %v3998_v28 = vpop.f32.mrb[30].mxu0  ;;  %v2156_v31 = vadd.f32 %v4028_v45, %v1755_v9 }
 0x153   : > { %v3999_v7 = vpop.f32.mrb[31].mxu0 }
 0x154   : > { %v1768_v41 = vadd.f32 %v3997_v27, %v1703_v53  ;;  %v4000_v32 = vadd.f32 %v3999_v7, %v3998_v28  ;;  %v4029_v34 = vpop.f32.mrb[24].mxu1 }
 0x155   : > { %v4030_v35 = vpop.f32.mrb[25].mxu1 }
 0x156   : > { %v1771_v29 = vadd.f32 %v4000_v32, %v1706_v61  ;;  %v4031_v36 = vadd.f32 %v4030_v35, %v4029_v34  ;;  %v4032_v38 = vpop.f32.mrb[26].mxu1 }
 0x157   : > { %v4033_v37 = vpop.f32.mrb[27].mxu1 }
 0x158   : > { %v4057_v19 = vpop.f32.mrb[32].mxu0  ;;  %v2161_v39 = vadd.f32 %v4031_v36, %v1760_v14  ;;  %v4034_v42 = vadd.f32 %v4033_v37, %v4032_v38 }
 0x159   : > { %v4058_v46 = vpop.f32.mrb[33].mxu0 }
 0x15a   : > { %v4059_v55 = vadd.f32 %v4058_v46, %v4057_v19  ;;  %v4060_v60 = vpop.f32.mrb[34].mxu0  ;;  %v2164_v48 = vadd.f32 %v4034_v42, %v1763_v20 }
 0x15b   : > { %v4061_v49 = vpop.f32.mrb[35].mxu0 }
 0x15c   : > { %v2210_v0 = vadd.f32 %v4059_v55, %v2145_v58  ;;  %v4062_v51 = vadd.f32 %v4061_v49, %v4060_v60  ;;  %v4035_v43 = vpop.f32.mrb[28].mxu1 }
 0x15d   : > { %v4036_v40 = vpop.f32.mrb[29].mxu1 }
 0x15e   : > { %v2213_v21 = vadd.f32 %v4062_v51, %v2148_v52  ;;  %v4037_v26 = vadd.f32 %v4036_v40, %v4035_v43  ;;  %v4038_v1 = vpop.f32.mrb[30].mxu1 }
 0x15f   : > { %v4039_v2 = vpop.f32.mrb[31].mxu1 }
 0x160   : > { %v2169_v3 = vadd.f32 %v4037_v26, %v1768_v41  ;;  %v4040_v53 = vadd.f32 %v4039_v2, %v4038_v1  ;;  %v4063_v56 = vpop.f32.mrb[36].mxu0 }
 0x161   : > { %v4064_v61 = vpop.f32.mrb[37].mxu0 }
 0x162   : > { %v2172_v54 = vadd.f32 %v4040_v53, %v1771_v29  ;;  %v4065_v63 = vadd.f32 %v4064_v61, %v4063_v56  ;;  %v4066_v6 = vpop.f32.mrb[38].mxu0 }
 0x163   : > { %v4067_v9 = vpop.f32.mrb[39].mxu0 }
 0x164   : > { %v4097_v18 = vpop.f32.mrb[32].mxu1  ;;  %v2218_v50 = vadd.f32 %v4065_v63, %v2153_v24  ;;  %v4068_v47 = vadd.f32 %v4067_v9, %v4066_v6 }
 0x165   : > { %v4098_v57 = vpop.f32.mrb[33].mxu1 }
 0x166   : > { %v4099_v62 = vadd.f32 %v4098_v57, %v4097_v18  ;;  %v4100_v5 = vpop.f32.mrb[34].mxu1  ;;  %v2221_v12 = vadd.f32 %v4068_v47, %v2156_v31 }
 0x167   : > { %v4101_v8 = vpop.f32.mrb[35].mxu1 }
 0x168   : > { %v5511_v10 = vadd.f32 %v4099_v62, %v2210_v0  ;;  %v4102_v11 = vadd.f32 %v4101_v8, %v4100_v5  ;;  %v4069_v4 = vpop.f32.mrb[40].mxu0 }
 0x169   : > { %v4070_v16 = vpop.f32.mrb[41].mxu0 }
 0x16a   : > { %v5513_v58 = vadd.f32 %v4102_v11, %v2213_v21  ;;  %v4071_v20 = vadd.f32 %v4070_v16, %v4069_v4  ;;  %v4072_v33 = vpop.f32.mrb[42].mxu0 }
 0x16b   : > { %v4073_v23 = vpop.f32.mrb[43].mxu0 }
 0x16c   : > { %v4103_v13 = vpop.f32.mrb[36].mxu1  ;;  %v2226_v17 = vadd.f32 %v4071_v20, %v2161_v39  ;;  %v4074_v24 = vadd.f32 %v4073_v23, %v4072_v33 }
 0x16d   : > { %v4104_v59 = vpop.f32.mrb[37].mxu1 }
 0x16e   : > { %v4105_v30 = vadd.f32 %v4104_v59, %v4103_v13  ;;  %v4106_v52 = vpop.f32.mrb[38].mxu1  ;;  %v2229_v25 = vadd.f32 %v4074_v24, %v2164_v48 }
 0x16f   : > { %v4107_v14 = vpop.f32.mrb[39].mxu1 }
 0x170   : > { %v5515_v15 = vadd.f32 %v4105_v30, %v2218_v50  ;;  %v4108_v44 = vadd.f32 %v4107_v14, %v4106_v52 }
 0x172   : > { %v5517_v22 = vadd.f32 %v4108_v44, %v2221_v12 }
 0x173   : > { %v4075_v34 = vpop.f32.mrb[44].mxu0 }
 0x174   : > { %v4109_v45 = vpop.f32.mrb[40].mxu1  ;;  %v4076_v29 = vpop.f32.mrb[45].mxu0 }
 0x175   : > { %v4110_v27 = vpop.f32.mrb[41].mxu1  ;;  %v4077_v36 = vadd.f32 %v4076_v29, %v4075_v34  ;;  %v4078_v38 = vpop.f32.mrb[46].mxu0 }
 0x176   : > { %v4111_v28 = vadd.f32 %v4110_v27, %v4109_v45  ;;  %v4112_v31 = vpop.f32.mrb[42].mxu1  ;;  %v4079_v37 = vpop.f32.mrb[47].mxu0 }
 0x177   : > { %v4113_v7 = vpop.f32.mrb[43].mxu1  ;;  %v2234_v19 = vadd.f32 %v4077_v36, %v2169_v3  ;;  %v4080_v42 = vadd.f32 %v4079_v37, %v4078_v38 }
 0x178   : > { %v5519_v41 = vadd.f32 %v4111_v28, %v2226_v17  ;;  %v4114_v32 = vadd.f32 %v4113_v7, %v4112_v31 }
 0x179   : > { %v2237_v55 = vadd.f32 %v4080_v42, %v2172_v54 }
 0x17a   : > { %v5521_v35 = vadd.f32 %v4114_v32, %v2229_v25 }
 0x17b   : > { %v4137_v43 = vpop.f32.mrb[48].mxu0 }
 0x17c   : > { %v4115_v39 = vpop.f32.mrb[44].mxu1  ;;  %v4138_v40 = vpop.f32.mrb[49].mxu0 }
 0x17d   : > { %v4116_v46 = vpop.f32.mrb[45].mxu1  ;;  %v4139_v26 = vadd.f32 %v4138_v40, %v4137_v43  ;;  %v4140_v1 = vpop.f32.mrb[50].mxu0 }
 0x17e   : > { %v4117_v60 = vadd.f32 %v4116_v46, %v4115_v39  ;;  %v4118_v48 = vpop.f32.mrb[46].mxu1  ;;  %v4141_v2 = vpop.f32.mrb[51].mxu0 }
 0x17f   : > { %v4119_v49 = vpop.f32.mrb[47].mxu1  ;;  %v4142_v53 = vadd.f32 %v4141_v2, %v4140_v1 }
 0x180   : > { %v5523_v0 = vadd.f32 %v4117_v60, %v2234_v19  ;;  %v4120_v51 = vadd.f32 %v4119_v49, %v4118_v48 }
 0x182   : > { %v5525_v21 = vadd.f32 %v4120_v51, %v2237_v55  ;;  %v5531_v51 = vld [vmem:[%s5628_s2] ss:$0 sm:$0xff] }
 0x183   : > { %v4143_v3 = vpop.f32.mrb[52].mxu0 }
 0x184   : > { %v4177_v18 = vpop.f32.mrb[48].mxu1  ;;  %v4144_v57 = vpop.f32.mrb[53].mxu0 }
 0x185   : > { %v4178_v56 = vpop.f32.mrb[49].mxu1  ;;  %v4145_v62 = vadd.f32 %v4144_v57, %v4143_v3  ;;  %v4146_v63 = vpop.f32.mrb[54].mxu0 }
 0x186   : > { %v4179_v61 = vadd.f32 %v4178_v56, %v4177_v18  ;;  %v4180_v54 = vpop.f32.mrb[50].mxu1  ;;  %v4147_v6 = vpop.f32.mrb[55].mxu0 }
 0x187   : > { %v4181_v5 = vpop.f32.mrb[51].mxu1  ;;  %v4148_v50 = vadd.f32 %v4147_v6, %v4146_v63 }
 0x188   : > { %v3127_v8 = vadd.f32 %v4179_v61, %v4139_v26  ;;  %v4182_v9 = vadd.f32 %v4181_v5, %v4180_v54 }
 0x18a   : > { %v3130_v11 = vadd.f32 %v4182_v9, %v4142_v53 }
 0x18b   : > { %v4149_v12 = vpop.f32.mrb[56].mxu0 }
 0x18c   : > { %v4183_v47 = vpop.f32.mrb[52].mxu1  ;;  %v4150_v59 = vpop.f32.mrb[57].mxu0 }
 0x18d   : > { %v4184_v13 = vpop.f32.mrb[53].mxu1  ;;  %v4151_v4 = vadd.f32 %v4150_v59, %v4149_v12  ;;  %v4152_v14 = vpop.f32.mrb[58].mxu0 }
 0x18e   : > { %v4185_v30 = vadd.f32 %v4184_v13, %v4183_v47  ;;  %v4186_v52 = vpop.f32.mrb[54].mxu1  ;;  %v4153_v44 = vpop.f32.mrb[59].mxu0 }
 0x18f   : > { %v4187_v16 = vpop.f32.mrb[55].mxu1  ;;  %v4154_v23 = vadd.f32 %v4153_v44, %v4152_v14 }
 0x190   : > { %v3135_v20 = vadd.f32 %v4185_v30, %v4145_v62  ;;  %v4188_v33 = vadd.f32 %v4187_v16, %v4186_v52 }
 0x192   : > { %v3138_v17 = vadd.f32 %v4188_v33, %v4148_v50 }
 0x193   : > { %v4155_v28 = vpop.f32.mrb[60].mxu0 }
 0x194   : > { %v4189_v24 = vpop.f32.mrb[56].mxu1  ;;  %v4156_v7 = vpop.f32.mrb[61].mxu0 }
 0x195   : > { %v4190_v45 = vpop.f32.mrb[57].mxu1  ;;  %v4157_v29 = vadd.f32 %v4156_v7, %v4155_v28  ;;  %v4158_v36 = vpop.f32.mrb[62].mxu0 }
 0x196   : > { %v4191_v25 = vadd.f32 %v4190_v45, %v4189_v24  ;;  %v4192_v27 = vpop.f32.mrb[58].mxu1  ;;  %v4159_v38 = vpop.f32.mrb[63].mxu0 }
 0x197   : > { %v4193_v31 = vpop.f32.mrb[59].mxu1  ;;  %v4160_v19 = vadd.f32 %v4159_v38, %v4158_v36 }
 0x198   : > { %v3143_v32 = vadd.f32 %v4191_v25, %v4151_v4  ;;  %v4194_v34 = vadd.f32 %v4193_v31, %v4192_v27 }
 0x19a   : > { %v3146_v37 = vadd.f32 %v4194_v34, %v4154_v23 }
 0x19b   : > { %v4217_v42 = vpop.f32.mrb[64].mxu0 }
 0x19c   : > { %v4218_v39 = vpop.f32.mrb[65].mxu0 }
 0x19d   : > { %v4219_v46 = vadd.f32 %v4218_v39, %v4217_v42  ;;  %v4220_v55 = vpop.f32.mrb[66].mxu0 }
 0x19e   : > { %v4221_v60 = vpop.f32.mrb[67].mxu0 }
 0x19f   : > { %v3192_v48 = vadd.f32 %v4219_v46, %v3127_v8  ;;  %v4222_v49 = vadd.f32 %v4221_v60, %v4220_v55 }
 0x1a1   : > { %v3222_v43 = vadd.f32 %v3192_v48, %v5511_v10  ;;  %v3195_v40 = vadd.f32 %v4222_v49, %v3130_v11 }
 0x1a3   : > { %v3237_v26 = vadd.f32 %v5531_v51, %v3222_v43  ;;  %v3223_v1 = vadd.f32 %v3195_v40, %v5513_v58  ;;  %v4223_v2 = vpop.f32.mrb[68].mxu0 }
 0x1a4   : > { %v4224_v53 = vpop.f32.mrb[69].mxu0 }
 0x1a5   : > { %v3245_v18 = vpack.c.bf16 %v3237_v26, %v3237_v26  ;;  %v3238_v3 = vadd.f32 %v5531_v51, %v3223_v1  ;;  %v4225_v56 = vadd.f32 %v4224_v53, %v4223_v2  ;;  %v4226_v57 = vpop.f32.mrb[70].mxu0 }
 0x1a6   : > { %v4227_v61 = vpop.f32.mrb[71].mxu0 }
 0x1a7   : > { %3254 = vst.msk [vmem:[%s5539_s9] sm:$0xf] %vm3253_vm1, %v3245_v18  ;;  %v3246_v10 = vpack.c.bf16 %v3238_v3, %v3238_v3  ;;  %v3200_v54 = vadd.f32 %v4225_v56, %v3135_v20  ;;  %v4228_v62 = vadd.f32 %v4227_v61, %v4226_v57 }
 0x1a9   : > { %3255 = vst.msk [vmem:[%s5539_s9 + $0x4] sm:$0xf] %vm3253_vm1, %v3246_v10  ;;  %v3224_v5 = vadd.f32 %v3200_v54, %v5515_v15  ;;  %v3203_v6 = vadd.f32 %v4228_v62, %v3138_v17 }
 0x1aa   : > { %v4195_v58 = vpop.f32.mrb[60].mxu1 }
 0x1ab   : > { %v4196_v63 = vpop.f32.mrb[61].mxu1  ;;  %v3239_v11 = vadd.f32 %v5531_v51, %v3224_v5  ;;  %v3225_v47 = vadd.f32 %v3203_v6, %v5517_v22 }
 0x1ac   : > { %v4197_v8 = vadd.f32 %v4196_v63, %v4195_v58  ;;  %v4198_v9 = vpop.f32.mrb[62].mxu1 }
 0x1ad   : > { %v4199_v50 = vpop.f32.mrb[63].mxu1  ;;  %v3247_v59 = vpack.c.bf16 %v3239_v11, %v3239_v11  ;;  %v3240_v30 = vadd.f32 %v5531_v51, %v3225_v47 }
 0x1ae   : > { %v3151_v12 = vadd.f32 %v4197_v8, %v4157_v29  ;;  %v4200_v13 = vadd.f32 %v4199_v50, %v4198_v9 }
 0x1af   : > { %3256 = vst.msk [vmem:[%s5539_s9 + $0x8] sm:$0xf] %vm3253_vm1, %v3247_v59  ;;  %v3248_v4 = vpack.c.bf16 %v3240_v30, %v3240_v30 }
 0x1b0   : > { %v3154_v52 = vadd.f32 %v4200_v13, %v4160_v19 }
 0x1b1   : > { %3257 = vst.msk [vmem:[%s5539_s9 + $0xc] sm:$0xf] %vm3253_vm1, %v3248_v4 }
 0x1b2   : > { %v4229_v14 = vpop.f32.mrb[64].mxu1 }
 0x1b3   : > { %v4230_v15 = vpop.f32.mrb[65].mxu1 }
 0x1b4   : > { %v4231_v16 = vadd.f32 %v4230_v15, %v4229_v14  ;;  %v4232_v44 = vpop.f32.mrb[66].mxu1 }
 0x1b5   : > { %v4233_v20 = vpop.f32.mrb[67].mxu1 }
 0x1b6   : > { %v3208_v33 = vadd.f32 %v4231_v16, %v3143_v32  ;;  %v4234_v23 = vadd.f32 %v4233_v20, %v4232_v44 }
 0x1b8   : > { %v3226_v22 = vadd.f32 %v3208_v33, %v5519_v41  ;;  %v3211_v17 = vadd.f32 %v4234_v23, %v3146_v37 }
 0x1ba   : > { %v3241_v24 = vadd.f32 %v5531_v51, %v3226_v22  ;;  %v3227_v45 = vadd.f32 %v3211_v17, %v5521_v35  ;;  %v4235_v25 = vpop.f32.mrb[68].mxu1 }
 0x1bb   : > { %v4236_v27 = vpop.f32.mrb[69].mxu1 }
 0x1bc   : > { %v3249_v28 = vpack.c.bf16 %v3241_v24, %v3241_v24  ;;  %v3242_v31 = vadd.f32 %v5531_v51, %v3227_v45  ;;  %v4237_v7 = vadd.f32 %v4236_v27, %v4235_v25  ;;  %v4238_v34 = vpop.f32.mrb[70].mxu1 }
 0x1bd   : > { %v4239_v29 = vpop.f32.mrb[71].mxu1 }
 0x1be   : > { %3258 = vst.msk [vmem:[%s5539_s9 + $0x10] sm:$0xf] %vm3253_vm1, %v3249_v28  ;;  %v3250_v32 = vpack.c.bf16 %v3242_v31, %v3242_v31  ;;  %v3216_v41 = vadd.f32 %v4237_v7, %v3151_v12  ;;  %v4240_v36 = vadd.f32 %v4239_v29, %v4238_v34 }
 0x1c0   : > { %3259 = vst.msk [vmem:[%s5539_s9 + $0x14] sm:$0xf] %vm3253_vm1, %v3250_v32  ;;  %v3228_v35 = vadd.f32 %v3216_v41, %v5523_v0  ;;  %v3219_v38 = vadd.f32 %v4240_v36, %v3154_v52 }
 0x1c2   : > { %v3243_v37 = vadd.f32 %v5531_v51, %v3228_v35  ;;  %v3229_v19 = vadd.f32 %v3219_v38, %v5525_v21 }
 0x1c4   : > { %v3251_v42 = vpack.c.bf16 %v3243_v37, %v3243_v37  ;;  %v3244_v39 = vadd.f32 %v5531_v51, %v3229_v19 }
 0x1c6   : > { %3260 = vst.msk [vmem:[%s5539_s9 + $0x18] sm:$0xf] %vm3253_vm1, %v3251_v42  ;;  %v3252_v0 = vpack.c.bf16 %v3244_v39, %v3244_v39 }
 0x1c8   : > { %3261 = vst.msk [vmem:[%s5539_s9 + $0x1c] sm:$0xf] %vm3253_vm1, %v3252_v0 }
 0x1c9   : > { %4558 = shalt.err (!%p4555_p5)
}
 0x1ca   : > { %s4559_s29 = scalar_lea.hbm %s5570_s21, 512  ;;  %s4563_s6 = scalar_lea.hbm %s5629_s3, 1024 }
 0x1cb   : > { %p4560_p6 = scmp.ne.s32.totalorder %s5570_s21, %s4559_s29  ;;  %p4564_p10 = scmp.lt.u32.totalorder %s5570_s21, %s5629_s3 }
 0x1cc   : > { %p4565_p11 = scmp.lt.u32.totalorder %s4563_s6, %s4559_s29  ;;  %p4567_p13 = scmp.lt.u32.totalorder %s4559_s29, %s5570_s21 }
 0x1cd   : > { %p4561_p7 = pnand %p4560_p6, %p4688_p4 }
 0x1ce   : > { %p4566_p12 = por %p4565_p11, %p4564_p10 }
 0x1cf   : > { %p4562_p9 = pneg %p4561_p7 }
 0x1d0   : > { %p4568_p0 = por %p4567_p13, %p4566_p12 }
 0x1d2   : > { %p4569_p1 = pnand %p4568_p0, %p4562_p9 }
 0x1d4   : > { %4572 = shalt.err (!%p4569_p1)
}
 0x1d5   : > { %s4626_s8 = smov 64   ;;  %s4627_s9 = smov 4  }
 0x1d6   : > { %4257 = dma.vmem_to_hbm [thread:$0]  (%p4688_p4), %s5572_s11, 512, %s5570_s21, %s5580_s15, %s4626_s8, %s4626_s8, %s4627_s9  }
 0x1d7 PF: > { %p4263_p2 = scmp.ge.s32.totalorder %s4623_s17, 2  ;;  %s3293_s10 = sand.u32 1, %s4603_s12  }
 0x1d8   : > { %s3294_s18 = scalar_lea.sflag [#allocation4], %s3293_s10 }
 0x1d9   : > { %p4260_p3 = pnand %p4263_p2, %p4695_p8 }
 0x1db   : > { %4598 = dma.done.wait (!%p4260_p3), %s3294_s18, 512  }
 0x1dc   : > { %4600 = vsyncadd (!%p4260_p3), %s3294_s18, 4294966784  ;;  %s16_s17 = sadd.s32 1, %s4623_s17   ;;  %s5638_s12 = smov %s4607_s13 }
 0x1dd   : > { %p13_p5 = scmp.ge.s32.totalorder %s16_s17, 4   ;;  %s5639_s13 = smov %s4611_s14 }
 0x1de   : > { %s5640_s14 = smov %s4701_s25  ;;  %s5641_s15 = smov %s4619_s16 }
 0x1df   : > { %s5642_s16 = smov %s5644_s20  ;;  %15 = sbr.rel (!%p13_p5) target bundleno = 4 (0x4), region = 92 }
 0x1e6   :  { %3299 = vsyncpa [#allocation4], 1 }
 0x1e7   :  { %3301 = vsyncpa [#allocation4 + $0x1], 1 }

</bundles_post_ra>
